<compile_context>
chip_gen: v6e
topology: v6e:2x2x1
jax: 0.10.0
libtpu: 0.0.40
codegen_flags: <defaults>
</compile_context>

<pallas_src>
import numpy as np
import jax
import jax.numpy as jnp
from jax.experimental import pallas as pl
from jax.experimental.pallas import tpu as pltpu

# ----------------------------- sizes ---------------------------------------
B = 2            # batch
C = 4            # class_num
D = 128          # embedding_dim
E = 64           # entity_embedding_dim (node_embed_dim)
TYPE_D = 50      # node_type_embed_dim (hard-coded 50 in the module)
H = 1024         # logic_entity_mlp hidden size (hard-coded 1024)
N = 8            # graph nodes per sample
T = 8            # entity tokens per node
S = 8            # sentence length
VOCAB = 64
ENT_VOCAB = 32
TYPE_VOCAB = 100

BNT = B * N * T  # 128  (merged-batch token rows)
BS = B * S       # 16
BC = B * C       # 8


# -------------------- fused Pallas kernel (whole forward) -------------------
def fused_forward_kernel(sent_ids_ref, ent_ids_ref, poolw_ref, logic_ref,
                         selm_ref, plm_ref, ent_ref,
                         w1_ref, b1_ref, w2_ref, b2_ref,
                         wlab_ref, wtext_ref, ball_ref,
                         wcls2_ref, bcls2_ref, out_ref):
    f32 = jnp.float32

    # ---- in-kernel embedding gathers via one-hot MXU matmuls ---------------
    # TODO(synk): PLMWithMaskEncoder / EntityEmbeddingLayer are external;
    # stubbed here as embedding tables (gathered with one-hot matmuls).
    tok_oh = (sent_ids_ref[...] ==
              jax.lax.broadcasted_iota(jnp.int32, (BS, VOCAB), 1)).astype(f32)
    tok_emb = jnp.dot(tok_oh, plm_ref[...],
                      preferred_element_type=f32)                    # (BS, D)

    ent_oh = (ent_ids_ref[...] ==
              jax.lax.broadcasted_iota(jnp.int32, (BNT, ENT_VOCAB), 1)).astype(f32)
    x = jnp.dot(ent_oh, ent_ref[...],
                preferred_element_type=f32)                          # (BNT, D)

    # ---- masked mean pooling (mask/count already folded into poolw rows) ---
    # poolw is (B*C, B*S): one identical row per (sample, class).
    text_bc = jnp.dot(poolw_ref[...], tok_emb,
                      preferred_element_type=f32)                    # (BC, D)

    # ---- logic_entity_mlp: Linear(D,1024) -> ReLU -> Linear(1024,D) --------
    # bf16 operands, f32 accumulation, full 1024-wide hidden (no chunking).
    xb = x.astype(jnp.bfloat16)
    hid = jnp.dot(xb, w1_ref[...],
                  preferred_element_type=f32) + b1_ref[...]          # (BNT, H)
    hid = jnp.maximum(hid, 0.0)
    mlp = jnp.dot(hid.astype(jnp.bfloat16), w2_ref[...],
                  preferred_element_type=f32) + b2_ref[...]          # (BNT, D)

    # cat(node_embeds[:kg], logic_mlp(node_embeds[kg:])) == per-token select
    y = jnp.where(logic_ref[...] > 0.0, mlp, x)                      # (BNT, D)

    # masked token sum of ONLY the C label nodes per sample (block-diag selm),
    # then the folded node_type_w @ node_proj @ cls_layer[label] matmul.
    z_lab = jnp.dot(selm_ref[...], y,
                    preferred_element_type=f32)                      # (BC, D)
    h_lab = jnp.dot(z_lab.astype(jnp.bfloat16), wlab_ref[...],
                    preferred_element_type=f32)                      # (BC, D)

    # context (node_proj(text) -> cls_layer[ctx]) + prompt (text -> cls_layer[txt])
    # folded into a single (D,D) matrix.  TODO(synk): fold valid only while
    # DiagGNN is an identity stub.
    h_text = jnp.dot(text_bc.astype(jnp.bfloat16), wtext_ref[...],
                     preferred_element_type=f32)                     # (BC, D)

    hcls = h_lab + h_text + ball_ref[...]                            # (BC, D)

    # cls_layer2: per-class elementwise mul with the tiled weight, lane reduce
    # emitted lane-dense as (1, B*C) via an NT dot_general with a ones row.
    g = hcls * wcls2_ref[...]                                        # (BC, D)
    ones_row = jnp.ones((1, D), f32)
    logits = jax.lax.dot_general(ones_row, g, (((1,), (1,)), ((), ())),
                                 preferred_element_type=f32)         # (1, BC)
    out_ref[...] = logits + bcls2_ref[...]


def run_fused(sent_ids, ent_ids, poolw, logic, selm, kp):
    # No grid: every operand is a single full block resident in VMEM
    # (total working set < 3 MiB incl. the 512 KiB MLP intermediate).
    vmem = lambda: pl.BlockSpec(memory_space=pltpu.MemorySpace.VMEM)
    return pl.pallas_call(
        fused_forward_kernel,
        out_shape=jax.ShapeDtypeStruct((1, BC), jnp.float32),
        in_specs=[vmem() for _ in range(16)],
        out_specs=vmem(),
    )(sent_ids, ent_ids, poolw, logic, selm,
      kp["plm_emb"], kp["ent_emb"],
      kp["w1"], kp["b1"], kp["w2"], kp["b2"],
      kp["W_lab"], kp["W_text"], kp["b_all"],
      kp["wcls2_bc"], kp["bcls2_row"])


# ----------------------------- full forward ---------------------------------
@jax.jit
def model_forward(kparams, sentence, sent_mask, nodes, node_mask, node_types,
                  edges, edge_types):
    # TODO(synk): node_types / edges / edge_types are only consumed by the
    # external DiagGNN (identity stub here), so they are unused.
    del node_types, edges, edge_types

    sent_ids = sentence.reshape(BS, 1).astype(jnp.int32)
    ent_ids = nodes.reshape(BNT, 1).astype(jnp.int32)

    # PLM masked-mean pooling matrix, block-diag over batch, one row per
    # (sample, class) so the kernel's text path is already 8 rows.
    m = sent_mask.astype(jnp.float32)                                 # (B,S)
    poolw_b = m / jnp.clip(m.sum(axis=1, keepdims=True), 1.0)         # (B,S)
    poolw = (jnp.eye(B, dtype=jnp.float32)[:, :, None]
             * poolw_b[None, :, :]).reshape(B, BS)                    # (B,B*S)
    poolw = jnp.repeat(poolw, C, axis=0)                              # (BC,B*S)

    # kg_node_num = first node index whose mask[:,1] is set (per sample);
    # nodes >= kg go through logic_entity_mlp.
    col = node_mask[:, :, 1] > 0                                      # (B,N)
    kg = jnp.where(jnp.any(col, axis=1), jnp.argmax(col, axis=1), N)
    logic_node = (jnp.arange(N)[None, :] >= kg[:, None]).astype(jnp.float32)
    logic = jnp.repeat(logic_node, T, axis=1).reshape(BNT, 1)         # (BNT,1)

    # Block-diagonal (label-node x token-mask) selector: only the C label
    # nodes actually consumed downstream, one row per (sample, class).
    nm = node_mask.astype(jnp.float32).reshape(B, N * T)              # (B,N*T)
    base = jnp.kron(jnp.eye(N, dtype=jnp.float32)[:C],
                    jnp.ones((1, T), jnp.float32))                    # (C,N*T)
    selm_b = base[None, :, :] * nm[:, None, :]                        # (B,C,N*T)
    selm = (jnp.eye(B, dtype=jnp.float32)[:, None, :, None]
            * selm_b[:, :, None, :]).reshape(BC, BNT)                 # (BC,BNT)

    out = run_fused(sent_ids, ent_ids, poolw, logic, selm, kparams)   # (1,BC)
    return out.reshape(B, C)


# ------------------------- pure-JAX reference (check) -----------------------
def reference_forward(params, sentence, sent_mask, nodes, node_mask,
                      node_types, edges, edge_types):
    hp = jax.lax.Precision.HIGHEST
    f = lambda a: a.astype(jnp.float32)

    tok_emb = jnp.take(params["plm_emb"], sentence, axis=0)           # (B,S,D)
    m = sent_mask.astype(jnp.float32)[..., None]
    text_vec = (tok_emb * m).sum(1) / jnp.clip(m.sum(1), 1.0)         # (B,D)

    node_embeds = jnp.take(params["ent_emb"], nodes, axis=0)          # (B,N,T,D)
    col = node_mask[:, :, 1] > 0
    kg = jnp.where(jnp.any(col, axis=1), jnp.argmax(col, axis=1), N)
    logic = (jnp.arange(N)[None, :] >= kg[:, None])[:, :, None, None]

    hmid = jnp.maximum(jnp.dot(node_embeds, f(params["w1"]), precision=hp)
                       + params["b1"], 0.0)
    mlp = jnp.dot(hmid, f(params["w2"]), precision=hp) + params["b2"]
    y = jnp.where(logic, mlp, node_embeds)
    y = jnp.dot(y, f(params["wt"]), precision=hp)
    z = (y * node_mask.astype(jnp.float32)[..., None]).sum(axis=2)    # (B,N,D)
    cat = jnp.concatenate([text_vec[:, None, :], z], axis=1)          # (B,N+1,D)
    proj = jnp.dot(cat, f(params["wp"]), precision=hp) + params["bp"]
    gnn_nodes = proj        # TODO(synk): DiagGNN external; identity stub here.

    context = gnn_nodes[:, 0, :]
    label = gnn_nodes[:, 1:1 + C, :]
    ans = jnp.broadcast_to(context[:, None, :], (B, C, E))
    prompt = jnp.broadcast_to(text_vec[:, None, :], (B, C, D))
    pool = jnp.concatenate([ans, label, prompt], axis=2)              # (B,C,2E+D)
    hcls = jnp.dot(pool, f(params["wc"]), precision=hp) + params["bc"]
    return (params["wcls2"][None] * hcls).sum(-1) + params["bcls2"][None]


# ------------------------------- setup --------------------------------------
def make_params(key):
    ks = jax.random.split(key, 10)
    xav = lambda k, shape: (jax.random.normal(k, shape, jnp.float32)
                            * np.sqrt(2.0 / (shape[-2] + shape[-1])))
    return {
        "plm_emb": jax.random.normal(ks[0], (VOCAB, D), jnp.float32) * 0.5,
        "ent_emb": jax.random.normal(ks[1], (ENT_VOCAB, D), jnp.float32) * 0.5,
        # entity_type_embed: only consumed by the stubbed DiagGNN (unused here).
        "type_emb": jax.random.normal(ks[2], (TYPE_VOCAB, TYPE_D),
                                      jnp.float32) * 0.5,
        # All matmul weights stored (in, out) and explicitly committed to bf16.
        "w1": xav(ks[3], (D, H)).astype(jnp.bfloat16),
        "b1": jnp.zeros((1, H), jnp.float32),
        "w2": xav(ks[4], (H, D)).astype(jnp.bfloat16),
        "b2": jnp.zeros((1, D), jnp.float32),
        "wt": xav(ks[5], (D, D)).astype(jnp.bfloat16),     # node_type_w.weight (x @ W)
        "wp": xav(ks[6], (D, E)).astype(jnp.bfloat16),     # node_proj
        "bp": jnp.zeros((1, E), jnp.float32),
        "wc": xav(ks[7], (2 * E + D, D)).astype(jnp.bfloat16),  # cls_layer
        "bc": jnp.zeros((1, D), jnp.float32),
        "wcls2": xav(ks[8], (C, D)),                       # cls_layer2
        "bcls2": jnp.zeros((C,), jnp.float32),
    }


def fold_params(p):
    """Fold node_type_w / node_proj / cls_layer into two (D,D) bf16 matrices.

    TODO(synk): this fold is only valid while the external DiagGNN is an
    identity stub; a real (nonlinear) GNN sits between node_proj and
    cls_layer, so these folds must be undone when it is integrated.
    """
    hp = jax.lax.Precision.HIGHEST
    wt = p["wt"].astype(jnp.float32)
    wp = p["wp"].astype(jnp.float32)
    wc = p["wc"].astype(jnp.float32)
    wc_ctx, wc_lab, wc_txt = wc[:E], wc[E:2 * E], wc[2 * E:]

    w_lab = jnp.dot(jnp.dot(wt, wp, precision=hp), wc_lab,
                    precision=hp).astype(jnp.bfloat16)                 # (D,D)
    w_text = (jnp.dot(wp, wc_ctx, precision=hp) + wc_txt).astype(jnp.bfloat16)
    b_all = (jnp.dot(p["bp"], wc_ctx, precision=hp)
             + jnp.dot(p["bp"], wc_lab, precision=hp) + p["bc"])       # (1,D)
    return {
        "plm_emb": p["plm_emb"], "ent_emb": p["ent_emb"],
        "w1": p["w1"], "b1": p["b1"], "w2": p["w2"], "b2": p["b2"],
        "W_lab": w_lab, "W_text": w_text,
        "b_all": b_all.astype(jnp.float32),
        "wcls2_bc": jnp.tile(p["wcls2"], (B, 1)),                      # (BC,D)
        "bcls2_row": jnp.tile(p["bcls2"], (B,)).reshape(1, BC),        # (1,BC)
    }


if __name__ == "__main__":
    key = jax.random.PRNGKey(0)
    kp_, k1, k2, k3, k4, k5 = jax.random.split(key, 6)
    params = make_params(kp_)
    kparams = fold_params(params)

    sentence = jax.random.randint(k1, (B, S), 0, VOCAB, jnp.int32)
    sent_mask = jnp.ones((B, S), jnp.int32)
    nodes = jax.random.randint(k2, (B, N, T), 0, ENT_VOCAB, jnp.int32)
    # Nodes 0..1 are KG nodes (mask column 1 stays 0), nodes 2..7 are "logic"
    # nodes (mask[:,1] set) -> kg_node_num = 2, so label nodes 0..1 take the
    # identity branch and label nodes 2..3 exercise the MLP branch.
    node_mask = np.zeros((B, N, T), np.float32)
    node_mask[:, :, 0] = 1.0
    node_mask[:, :2, 2:4] = 1.0
    node_mask[:, 2:, 1] = 1.0
    node_mask = jnp.asarray(node_mask)
    node_types = jax.random.randint(k3, (B, N), 0, TYPE_VOCAB, jnp.int32)
    edges = jax.random.randint(k4, (B, 2, 12), 0, N + 1, jnp.int32)
    edge_types = jax.random.randint(k5, (B, 12), 0, 50, jnp.int32)

    out = model_forward(kparams, sentence, sent_mask, nodes, node_mask,
                        node_types, edges, edge_types)
    out = jax.block_until_ready(out)

    ref = reference_forward(params, sentence, sent_mask, nodes, node_mask,
                            node_types, edges, edge_types)
    # Tolerance reflects the explicit commitment to bf16 matmul operands
    # (activation + folded-weight quantization); expected error is ~10x smaller.
    np.testing.assert_allclose(np.asarray(out), np.asarray(ref),
                               rtol=1e-2, atol=1e-2)
    assert out.shape == (B, C)
    print("KERNEL_OK")
</pallas_src>

<mosaic_0001>
module attributes {stable_mosaic.version = 11 : i64} {
  func.func @fused_forward_kernel(%arg0: memref<16x1xi32, #tpu.memory_space<vmem>>, %arg1: memref<128x1xi32, #tpu.memory_space<vmem>>, %arg2: memref<8x16xf32, #tpu.memory_space<vmem>>, %arg3: memref<128x1xf32, #tpu.memory_space<vmem>>, %arg4: memref<8x128xf32, #tpu.memory_space<vmem>>, %arg5: memref<64x128xf32, #tpu.memory_space<vmem>>, %arg6: memref<32x128xf32, #tpu.memory_space<vmem>>, %arg7: memref<128x1024xbf16, #tpu.memory_space<vmem>>, %arg8: memref<1x1024xf32, #tpu.memory_space<vmem>>, %arg9: memref<1024x128xbf16, #tpu.memory_space<vmem>>, %arg10: memref<1x128xf32, #tpu.memory_space<vmem>>, %arg11: memref<128x128xbf16, #tpu.memory_space<vmem>>, %arg12: memref<128x128xbf16, #tpu.memory_space<vmem>>, %arg13: memref<1x128xf32, #tpu.memory_space<vmem>>, %arg14: memref<8x128xf32, #tpu.memory_space<vmem>>, %arg15: memref<1x8xf32, #tpu.memory_space<vmem>>, %arg16: memref<1x8xf32, #tpu.memory_space<vmem>>) attributes {dimension_semantics = [], scalar_prefetch = 0 : i64, scratch_operands = 0 : i64, tpu.core_type = #tpu.core_type<tc>} {
    %c0 = arith.constant 0 : index
    %c0_0 = arith.constant 0 : index
    %0 = vector.load %arg0[%c0, %c0_0] : memref<16x1xi32, #tpu.memory_space<vmem>>, vector<16x1xi32>
    %1 = tpu.iota {dimensions = array<i32: 1>} : vector<16x64xi32>
    %2 = vector.broadcast %0 : vector<16x1xi32> to vector<16x64xi32>
    %3 = arith.cmpi eq, %2, %1 : vector<16x64xi32>
    %4 = arith.extui %3 : vector<16x64xi1> to vector<16x64xi32>
    %5 = arith.sitofp %4 : vector<16x64xi32> to vector<16x64xf32>
    %c0_1 = arith.constant 0 : index
    %c0_2 = arith.constant 0 : index
    %6 = vector.load %arg5[%c0_1, %c0_2] : memref<64x128xf32, #tpu.memory_space<vmem>>, vector<64x128xf32>
    %cst = arith.constant dense<0.000000e+00> : vector<16x128xf32>
    %7 = tpu.matmul %5, %6, %cst {dimension_numbers = #tpu.dot_dimension_numbers<[1], [0], [0], [1], [0, 0, 1, 1], [], []>} : vector<16x64xf32>, vector<64x128xf32>, vector<16x128xf32> -> vector<16x128xf32>
    %c0_3 = arith.constant 0 : index
    %c0_4 = arith.constant 0 : index
    %8 = vector.load %arg1[%c0_3, %c0_4] : memref<128x1xi32, #tpu.memory_space<vmem>>, vector<128x1xi32>
    %9 = tpu.iota {dimensions = array<i32: 1>} : vector<128x32xi32>
    %10 = vector.broadcast %8 : vector<128x1xi32> to vector<128x32xi32>
    %11 = arith.cmpi eq, %10, %9 : vector<128x32xi32>
    %12 = arith.extui %11 : vector<128x32xi1> to vector<128x32xi32>
    %13 = arith.sitofp %12 : vector<128x32xi32> to vector<128x32xf32>
    %c0_5 = arith.constant 0 : index
    %c0_6 = arith.constant 0 : index
    %14 = vector.load %arg6[%c0_5, %c0_6] : memref<32x128xf32, #tpu.memory_space<vmem>>, vector<32x128xf32>
    %cst_7 = arith.constant dense<0.000000e+00> : vector<128x128xf32>
    %15 = tpu.matmul %13, %14, %cst_7 {dimension_numbers = #tpu.dot_dimension_numbers<[1], [0], [0], [1], [0, 0, 1, 1], [], []>} : vector<128x32xf32>, vector<32x128xf32>, vector<128x128xf32> -> vector<128x128xf32>
    %c0_8 = arith.constant 0 : index
    %c0_9 = arith.constant 0 : index
    %16 = vector.load %arg2[%c0_8, %c0_9] : memref<8x16xf32, #tpu.memory_space<vmem>>, vector<8x16xf32>
    %cst_10 = arith.constant dense<0.000000e+00> : vector<8x128xf32>
    %17 = tpu.matmul %16, %7, %cst_10 {dimension_numbers = #tpu.dot_dimension_numbers<[1], [0], [0], [1], [0, 0, 1, 1], [], []>} : vector<8x16xf32>, vector<16x128xf32>, vector<8x128xf32> -> vector<8x128xf32>
    %18 = arith.truncf %15 : vector<128x128xf32> to vector<128x128xbf16>
    %c0_11 = arith.constant 0 : index
    %c0_12 = arith.constant 0 : index
    %19 = vector.load %arg7[%c0_11, %c0_12] : memref<128x1024xbf16, #tpu.memory_space<vmem>>, vector<128x1024xbf16>
    %cst_13 = arith.constant dense<0.000000e+00> : vector<128x1024xf32>
    %20 = tpu.matmul %18, %19, %cst_13 {dimension_numbers = #tpu.dot_dimension_numbers<[1], [0], [0], [1], [0, 0, 1, 1], [], []>} : vector<128x128xbf16>, vector<128x1024xbf16>, vector<128x1024xf32> -> vector<128x1024xf32>
    %c0_14 = arith.constant 0 : index
    %c0_15 = arith.constant 0 : index
    %21 = vector.load %arg8[%c0_14, %c0_15] : memref<1x1024xf32, #tpu.memory_space<vmem>>, vector<1x1024xf32>
    %22 = vector.broadcast %21 : vector<1x1024xf32> to vector<128x1024xf32>
    %23 = arith.addf %20, %22 : vector<128x1024xf32>
    %cst_16 = arith.constant 0.000000e+00 : f32
    %24 = vector.broadcast %cst_16 : f32 to vector<128x1024xf32>
    %25 = arith.maximumf %23, %24 : vector<128x1024xf32>
    %26 = arith.truncf %25 : vector<128x1024xf32> to vector<128x1024xbf16>
    %c0_17 = arith.constant 0 : index
    %c0_18 = arith.constant 0 : index
    %27 = vector.load %arg9[%c0_17, %c0_18] : memref<1024x128xbf16, #tpu.memory_space<vmem>>, vector<1024x128xbf16>
    %cst_19 = arith.constant dense<0.000000e+00> : vector<128x128xf32>
    %28 = tpu.matmul %26, %27, %cst_19 {dimension_numbers = #tpu.dot_dimension_numbers<[1], [0], [0], [1], [0, 0, 1, 1], [], []>} : vector<128x1024xbf16>, vector<1024x128xbf16>, vector<128x128xf32> -> vector<128x128xf32>
    %c0_20 = arith.constant 0 : index
    %c0_21 = arith.constant 0 : index
    %29 = vector.load %arg10[%c0_20, %c0_21] : memref<1x128xf32, #tpu.memory_space<vmem>>, vector<1x128xf32>
    %30 = vector.broadcast %29 : vector<1x128xf32> to vector<128x128xf32>
    %31 = arith.addf %28, %30 : vector<128x128xf32>
    %c0_22 = arith.constant 0 : index
    %c0_23 = arith.constant 0 : index
    %32 = vector.load %arg3[%c0_22, %c0_23] : memref<128x1xf32, #tpu.memory_space<vmem>>, vector<128x1xf32>
    %cst_24 = arith.constant 0.000000e+00 : f32
    %33 = vector.broadcast %cst_24 : f32 to vector<128x1xf32>
    %34 = arith.cmpf ogt, %32, %33 : vector<128x1xf32>
    %35 = vector.shape_cast %34 : vector<128x1xi1> to vector<128x1xi1>
    %36 = vector.broadcast %35 : vector<128x1xi1> to vector<128x128xi1>
    %37 = arith.select %36, %31, %15 : vector<128x128xi1>, vector<128x128xf32>
    %c0_25 = arith.constant 0 : index
    %c0_26 = arith.constant 0 : index
    %38 = vector.load %arg4[%c0_25, %c0_26] : memref<8x128xf32, #tpu.memory_space<vmem>>, vector<8x128xf32>
    %cst_27 = arith.constant dense<0.000000e+00> : vector<8x128xf32>
    %39 = tpu.matmul %38, %37, %cst_27 {dimension_numbers = #tpu.dot_dimension_numbers<[1], [0], [0], [1], [0, 0, 1, 1], [], []>} : vector<8x128xf32>, vector<128x128xf32>, vector<8x128xf32> -> vector<8x128xf32>
    %40 = arith.truncf %39 : vector<8x128xf32> to vector<8x128xbf16>
    %c0_28 = arith.constant 0 : index
    %c0_29 = arith.constant 0 : index
    %41 = vector.load %arg11[%c0_28, %c0_29] : memref<128x128xbf16, #tpu.memory_space<vmem>>, vector<128x128xbf16>
    %cst_30 = arith.constant dense<0.000000e+00> : vector<8x128xf32>
    %42 = tpu.matmul %40, %41, %cst_30 {dimension_numbers = #tpu.dot_dimension_numbers<[1], [0], [0], [1], [0, 0, 1, 1], [], []>} : vector<8x128xbf16>, vector<128x128xbf16>, vector<8x128xf32> -> vector<8x128xf32>
    %43 = arith.truncf %17 : vector<8x128xf32> to vector<8x128xbf16>
    %c0_31 = arith.constant 0 : index
    %c0_32 = arith.constant 0 : index
    %44 = vector.load %arg12[%c0_31, %c0_32] : memref<128x128xbf16, #tpu.memory_space<vmem>>, vector<128x128xbf16>
    %cst_33 = arith.constant dense<0.000000e+00> : vector<8x128xf32>
    %45 = tpu.matmul %43, %44, %cst_33 {dimension_numbers = #tpu.dot_dimension_numbers<[1], [0], [0], [1], [0, 0, 1, 1], [], []>} : vector<8x128xbf16>, vector<128x128xbf16>, vector<8x128xf32> -> vector<8x128xf32>
    %46 = arith.addf %42, %45 : vector<8x128xf32>
    %c0_34 = arith.constant 0 : index
    %c0_35 = arith.constant 0 : index
    %47 = vector.load %arg13[%c0_34, %c0_35] : memref<1x128xf32, #tpu.memory_space<vmem>>, vector<1x128xf32>
    %48 = vector.broadcast %47 : vector<1x128xf32> to vector<8x128xf32>
    %49 = arith.addf %46, %48 : vector<8x128xf32>
    %c0_36 = arith.constant 0 : index
    %c0_37 = arith.constant 0 : index
    %50 = vector.load %arg14[%c0_36, %c0_37] : memref<8x128xf32, #tpu.memory_space<vmem>>, vector<8x128xf32>
    %51 = arith.mulf %49, %50 : vector<8x128xf32>
    %cst_38 = arith.constant 1.000000e+00 : f32
    %52 = vector.broadcast %cst_38 : f32 to vector<1x128xf32>
    %cst_39 = arith.constant dense<0.000000e+00> : vector<1x8xf32>
    %53 = tpu.matmul %52, %51, %cst_39 {dimension_numbers = #tpu.dot_dimension_numbers<[1], [1], [0], [0], [0, 0, 1, 0], [], []>} : vector<1x128xf32>, vector<8x128xf32>, vector<1x8xf32> -> vector<1x8xf32>
    %c0_40 = arith.constant 0 : index
    %c0_41 = arith.constant 0 : index
    %54 = vector.load %arg15[%c0_40, %c0_41] : memref<1x8xf32, #tpu.memory_space<vmem>>, vector<1x8xf32>
    %55 = arith.addf %53, %54 : vector<1x8xf32>
    %c0_42 = arith.constant 0 : index
    %c0_43 = arith.constant 0 : index
    %56 = vector.load %arg16[%c0_42, %c0_43] : memref<1x8xf32, #tpu.memory_space<vmem>>, vector<1x8xf32>
    tpu.vector_store %arg16[%c0_42, %c0_43], %55 {strides = array<i32>} : memref<1x8xf32, #tpu.memory_space<vmem>>, vector<1x8xf32>,
    return
  }
}

</mosaic_0001>

<bundles_post_ra>
// kernel: mul.46
= control target key start
LH: loop header
LB: loop body
LE: loop exit
PB: predicated region body
PF: predicated region fallthrough
CT: control target
= control target key end

     0   :  { %s7_s6 = smov 3  ;;  %s21_s9 = smov 3  ;;  %vm4_vm0 = vcmask 64512   ;;  %vm11_vm1 = vcmask 523712   ;;  %vm18_vm2 = vcmask 458112   ;;  %vm25_vm3 = vcmask 392512   ;;  %s121_s0 = inlined_call_operand.vmem [shape: f32[2,8,8], index: 0, kind: input, shape index: {}]   ;;  %s122_s1 = inlined_call_operand.vmem [shape: f32[2,64], index: 1, kind: output, shape index: {}]  }
   0x1   :  { %v63_v0 = vld [vmem:[%s121_s0 + $0x7] ss:$8 sm:%s7_s6]   ;;  %s77_s10 = smov 56   ;;  %v65_v1 = vld [vmem:[%s121_s0 + $0x5] ss:$8 sm:%s21_s9]   ;;  %s14_s13 = smov 3 }
   0x2   :  { %9 = vrot.lane.b32.xlu0 %v63_v0, %s77_s10  ;;  %s78_s14 = smov 40   ;;  %v64_v2 = vld [vmem:[%s121_s0 + $0x6] ss:$8 sm:%s14_s13]   ;;  %s28_s17 = smov 3  ;;  %vm32_vm4 = vcmask 326912   ;;  %vm39_vm5 = vcmask 261312  }
   0x3   :  { %23 = vrot.lane.b32.xlu1 %v65_v1, %s78_s14  ;;  %v66_v3 = vld [vmem:[%s121_s0 + $0x4] ss:$8 sm:%s28_s17]   ;;  %s35_s20 = smov 3  ;;  %s42_s21 = smov 3  ;;  %vm46_vm6 = vcmask 195712   ;;  %vm53_vm7 = vcmask 130112  }
   0x4   :  { %s79_s22 = smov 48   ;;  %s80_s23 = smov 32   ;;  %v67_v4 = vld [vmem:[%s121_s0 + $0x3] ss:$8 sm:%s35_s20]   ;;  %v68_v5 = vld [vmem:[%s121_s0 + $0x2] ss:$8 sm:%s42_s21]  }
   0x5   :  { %s2_s26 = smov 3  ;;  %s49_s29 = smov 3 }
   0x6   :  { %16 = vrot.lane.b32.xlu0 %v64_v2, %s79_s22  ;;  %v3_v6 = vld [vmem:[%s121_s0] ss:$8 sm:%s2_s26]   ;;  %s81_s3 = smov 24   ;;  %s82_s4 = smov 16  }
   0x7   :  { %30 = vrot.lane.b32.xlu1 %v66_v3, %s80_s23  ;;  %5 = vst.msk [vmem:[#allocation0] sm:$0x3] %vm4_vm0, %v3_v6   ;;  %v69_v7 = vld [vmem:[%s121_s0 + $0x1] ss:$8 sm:%s49_s29]   ;;  %s83_s0 = smov 8  }
   0xa   :  { %37 = vrot.lane.b32.xlu0 %v67_v4, %s81_s3 }
   0xb   :  { %44 = vrot.lane.b32.xlu1 %v68_v5, %s82_s4 }
   0xe   :  { %51 = vrot.lane.b32.xlu0 %v69_v7, %s83_s0 }
  0x74   :  { %v10_v8 = vpop.permute.xlu0 %9  }
  0x75   :  { %12 = vst.msk [vmem:[#allocation0] sm:$0x3] %vm11_vm1, %v10_v8   ;;  %v24_v9 = vpop.permute.xlu1 %23  }
  0x78   :  { %v17_v10 = vpop.permute.xlu0 %16  }
  0x79   :  { %19 = vst.msk [vmem:[#allocation0] sm:$0x3] %vm18_vm2, %v17_v10   ;;  %v31_v11 = vpop.permute.xlu1 %30  }
  0x7a   :  { %26 = vst.msk [vmem:[#allocation0] sm:$0x3] %vm25_vm3, %v24_v9  }
  0x7b   :  { %33 = vst.msk [vmem:[#allocation0] sm:$0x3] %vm32_vm4, %v31_v11  }
  0x7c   :  { %v38_v12 = vpop.permute.xlu0 %37  }
  0x7d   :  { %40 = vst.msk [vmem:[#allocation0] sm:$0x3] %vm39_vm5, %v38_v12   ;;  %v45_v13 = vpop.permute.xlu1 %44  }
  0x7e   :  { %47 = vst.msk [vmem:[#allocation0] sm:$0x3] %vm46_vm6, %v45_v13  }
  0x80   :  { %v52_v14 = vpop.permute.xlu0 %51  }
  0x81   :  { %54 = vst.msk [vmem:[#allocation0] sm:$0x3] %vm53_vm7, %v52_v14  }
  0x88   :  { %v59_v15 = vld [vmem:[#allocation0] sm:$0x3] }
  0x89   :  { %62 = vst [vmem:[%s122_s1] sm:$0x3] %v59_v15 }

// kernel: model_forward.1
= control target key start
LH: loop header
LB: loop body
LE: loop exit
PB: predicated region body
PF: predicated region fallthrough
CT: control target
= control target key end

     0   :  { %s5154_s0 = inlined_call_operand.vmem [shape: s32[16,1], index: 0, kind: input, shape index: {}]   ;;  %s5155_s1 = inlined_call_operand.vmem [shape: s32[128,1], index: 1, kind: input, shape index: {}]   ;;  %s5156_s2 = inlined_call_operand.vmem [shape: f32[8,16], index: 2, kind: input, shape index: {}]   ;;  %s5157_s3 = inlined_call_operand.vmem [shape: f32[128,1], index: 3, kind: input, shape index: {}]   ;;  %s5158_s4 = inlined_call_operand.vmem [shape: f32[8,128], index: 4, kind: input, shape index: {}]   ;;  %s5159_s5 = inlined_call_operand.hbm [shape: f32[64,128], index: 5, kind: input, shape index: {}]   ;;  %s5160_s6 = inlined_call_operand.vmem [shape: f32[32,128], index: 6, kind: input, shape index: {}]   ;;  %s5161_s7 = inlined_call_operand.vmem [shape: bf16[128,1024], index: 7, kind: input, shape index: {}]   ;;  %s5162_s8 = inlined_call_operand.vmem [shape: f32[1,1024], index: 8, kind: input, shape index: {}]   ;;  %s5163_s9 = inlined_call_operand.hbm [shape: bf16[1024,128], index: 9, kind: input, shape index: {}]   ;;  %s5164_s10 = inlined_call_operand.hbm [shape: f32[1,128], index: 10, kind: input, shape index: {}]   ;;  %s5165_s11 = inlined_call_operand.hbm [shape: bf16[128,128], index: 11, kind: input, shape index: {}]   ;;  %s5166_s12 = inlined_call_operand.hbm [shape: bf16[128,128], index: 12, kind: input, shape index: {}]   ;;  %s5167_s13 = inlined_call_operand.hbm [shape: f32[1,128], index: 13, kind: input, shape index: {}]   ;;  %s5168_s14 = inlined_call_operand.hbm [shape: f32[8,128], index: 14, kind: input, shape index: {}]   ;;  %s5169_s15 = inlined_call_operand.hbm [shape: f32[1,8], index: 15, kind: input, shape index: {}]   ;;  %s5170_s16 = inlined_call_operand.vmem [shape: f32[1,8], index: 16, kind: output, shape index: {}]  }
   0x1   :  { %5187 = sst [smem:[#allocation53_spill]] %s5154_s0 }
   0x2   :  { %21 = vsyncpa [#allocation3], 0 }
   0x3   :  { %22 = vsyncpa [#allocation5], 0 }
   0x4   :  { %23 = vsyncpa [#allocation8], 0 }
   0x5   :  { %24 = vsyncpa [#allocation11], 0 }
   0x6   :  { %25 = vsyncpa [#allocation14], 0  ;;  %s4047_s21 = smov [#allocation4]  }
   0x7   :  { %s59_s22 = sshll.u32 %s4047_s21, 4  ;;  %s60_s22 = int_to_ptr.vmem [resolvable:$true] %s59_s22 }
   0x8   :  { %s3885_s23 = scalar_lea.vmem %s60_s22, 8192  ;;  %p3890_p1 = scmp.lt.s32.totalorder %s60_s22, %s60_s22 }
   0x9   :  { %p3886_p0 = scmp.ne.s32.totalorder %s60_s22, %s3885_s23  ;;  %p3891_p2 = scmp.lt.s32.totalorder %s3885_s23, %s3885_s23 }
   0xb   :  { %p3892_p3 = por %p3891_p2, %p3890_p1 }
   0xd   :  { %p3893_p4 = pnand %p3892_p3, %p3886_p0 }
   0xf   :  { %3896 = shalt.err (!%p3893_p4)
}
  0x10   :  { %s4048_s24 = smov 64   ;;  %s4049_s25 = smov 4  }
  0x11   :  { %65 = dma.hbm_to_vmem [thread:$0]  %s5163_s9, 8192, %s60_s22, [#allocation5], %s4048_s24, %s4048_s24, %s4049_s25  }
  0x12   :  { %s4050_s28 = smov [#allocation7]   ;;  %s4051_s30 = smov [#allocation10]  }
  0x13   :  { %s81_s29 = sshll.u32 %s4050_s28, 4  ;;  %s106_s0 = sshll.u32 %s4051_s30, 4  ;;  %s82_s29 = int_to_ptr.vmem [resolvable:$true] %s81_s29  ;;  %s107_s0 = int_to_ptr.vmem [resolvable:$true] %s106_s0 }
  0x14   :  { %s3905_s17 = scalar_lea.vmem %s82_s29, 1024  ;;  %p3910_p6 = scmp.lt.s32.totalorder %s82_s29, %s82_s29 }
  0x15   :  { %p3906_p5 = scmp.ne.s32.totalorder %s82_s29, %s3905_s17  ;;  %p3911_p7 = scmp.lt.s32.totalorder %s3905_s17, %s3905_s17 }
  0x17   :  { %p3912_p8 = por %p3911_p7, %p3910_p6 }
  0x19   :  { %p3913_p9 = pnand %p3912_p8, %p3906_p5 }
  0x1b   :  { %3916 = shalt.err (!%p3913_p9)
}
  0x1c   :  { %87 = dma.hbm_to_vmem [thread:$0]  %s5165_s11, 1024, %s82_s29, [#allocation8], %s4048_s24, %s4048_s24, %s4049_s25  }
  0x1d   :  { %s3925_s9 = scalar_lea.vmem %s107_s0, 16  ;;  %s3929_s20 = scalar_lea.vmem %s107_s0, 32 }
  0x1e   :  { %p3926_p10 = scmp.ne.s32.totalorder %s107_s0, %s3925_s9  ;;  %p3930_p11 = scmp.lt.s32.totalorder %s107_s0, %s107_s0 }
  0x1f   :  { %p3931_p12 = scmp.lt.s32.totalorder %s3929_s20, %s3925_s9 }
  0x21   :  { %p3932_p13 = por %p3931_p12, %p3930_p11 }
  0x23   :  { %p3933_p0 = pnand %p3932_p13, %p3926_p10 }
  0x25   :  { %3936 = shalt.err (!%p3933_p0)
}
  0x26   :  { %109 = dma.hbm_to_vmem [thread:$0]  %s5167_s13, 16, %s107_s0, [#allocation11]  }
  0x27   :  { %s4052_s23 = smov [#allocation2]  }
  0x28   :  { %s41_s26 = sshll.u32 %s4052_s23, 4  ;;  %s42_s26 = int_to_ptr.vmem [resolvable:$true] %s41_s26 }
  0x29   :  { %s3945_s27 = scalar_lea.vmem %s42_s26, 1024  ;;  %p3950_p2 = scmp.lt.s32.totalorder %s42_s26, %s42_s26 }
  0x2a   :  { %p3946_p1 = scmp.ne.s32.totalorder %s42_s26, %s3945_s27  ;;  %p3951_p3 = scmp.lt.s32.totalorder %s3945_s27, %s3945_s27 }
  0x2c   :  { %p3952_p4 = por %p3951_p3, %p3950_p2 }
  0x2e   :  { %p3953_p5 = pnand %p3952_p4, %p3946_p1 }
  0x30   :  { %3956 = shalt.err (!%p3953_p5)
}
  0x31   :  { %s4053_s11 = smov 128   ;;  %s4054_s28 = smov 8  }
  0x32   :  { %47 = dma.hbm_to_vmem [thread:$0]  %s5159_s5, 1024, %s42_s26, [#allocation3], %s4053_s11, %s4053_s11, %s4054_s28  }
  0x33   :  { %s4055_s17 = smov [#allocation6]   ;;  %s4056_s19 = smov [#allocation9]  }
  0x34   :  { %s72_s18 = sshll.u32 %s4055_s17, 4  ;;  %s93_s13 = sshll.u32 %s4056_s19, 4  ;;  %s73_s18 = int_to_ptr.vmem [resolvable:$true] %s72_s18  ;;  %s94_s13 = int_to_ptr.vmem [resolvable:$true] %s93_s13 }
  0x35   :  { %s3965_s0 = scalar_lea.vmem %s73_s18, 16  ;;  %s3969_s9 = scalar_lea.vmem %s73_s18, 32 }
  0x36   :  { %p3966_p6 = scmp.ne.s32.totalorder %s73_s18, %s3965_s0  ;;  %p3970_p7 = scmp.lt.s32.totalorder %s73_s18, %s73_s18 }
  0x37   :  { %p3971_p8 = scmp.lt.s32.totalorder %s3969_s9, %s3965_s0 }
  0x39   :  { %p3972_p9 = por %p3971_p8, %p3970_p7 }
  0x3b   :  { %p3973_p10 = pnand %p3972_p9, %p3966_p6 }
  0x3d   :  { %3976 = shalt.err (!%p3973_p10)
}
  0x3e   :  { %75 = dma.hbm_to_vmem [thread:$0]  %s5164_s10, 16, %s73_s18, [#allocation5]  }
  0x3f   :  { %s3985_s22 = scalar_lea.vmem %s94_s13, 1024  ;;  %p3990_p12 = scmp.lt.s32.totalorder %s94_s13, %s94_s13 }
  0x40   :  { %p3986_p11 = scmp.ne.s32.totalorder %s94_s13, %s3985_s22  ;;  %p3991_p13 = scmp.lt.s32.totalorder %s3985_s22, %s3985_s22 }
  0x42   :  { %p3992_p0 = por %p3991_p13, %p3990_p12 }
  0x44   :  { %p3993_p1 = pnand %p3992_p0, %p3986_p11 }
  0x46   :  { %3996 = shalt.err (!%p3993_p1)
}
  0x47   :  { %99 = dma.hbm_to_vmem [thread:$0]  %s5166_s12, 1024, %s94_s13, [#allocation8], %s4048_s24, %s4048_s24, %s4049_s25  }
  0x48   :  { %s4057_s26 = smov [#allocation12]   ;;  %s4058_s11 = smov [#allocation13]  }
  0x49   :  { %s116_s27 = sshll.u32 %s4057_s26, 4  ;;  %s126_s28 = sshll.u32 %s4058_s11, 4  ;;  %s117_s27 = int_to_ptr.vmem [resolvable:$true] %s116_s27  ;;  %s127_s28 = int_to_ptr.vmem [resolvable:$true] %s126_s28 }
  0x4a   :  { %s4005_s10 = scalar_lea.vmem %s117_s27, 128  ;;  %p4010_p3 = scmp.lt.s32.totalorder %s117_s27, %s117_s27 }
  0x4b   :  { %p4006_p2 = scmp.ne.s32.totalorder %s117_s27, %s4005_s10  ;;  %p4011_p4 = scmp.lt.s32.totalorder %s4005_s10, %s4005_s10 }
  0x4d   :  { %p4012_p5 = por %p4011_p4, %p4010_p3 }
  0x4f   :  { %p4013_p6 = pnand %p4012_p5, %p4006_p2 }
  0x51   :  { %4016 = shalt.err (!%p4013_p6)
}
  0x52   :  { %119 = dma.hbm_to_vmem [thread:$0]  %s5168_s14, 128, %s117_s27, [#allocation11]  }
  0x53   :  { %s4025_s17 = scalar_lea.vmem %s127_s28, 16  ;;  %s4029_s12 = scalar_lea.vmem %s127_s28, 32 }
  0x54   :  { %p4026_p7 = scmp.ne.s32.totalorder %s127_s28, %s4025_s17  ;;  %p4030_p8 = scmp.lt.s32.totalorder %s127_s28, %s127_s28 }
  0x55   :  { %p4031_p9 = scmp.lt.s32.totalorder %s4029_s12, %s4025_s17 }
  0x57   :  { %p4032_p10 = por %p4031_p9, %p4030_p8 }
  0x59   :  { %p4033_p11 = pnand %p4032_p10, %p4026_p7 }
  0x5b   :  { %4036 = shalt.err (!%p4033_p11)
}
  0x5c   :  { %129 = dma.hbm_to_vmem [thread:$0]  %s5169_s15, 16, %s127_s28, [#allocation14]  }
  0x5d   :  { %4037 = dma.done.wait [#allocation3], 1024  }
  0x5e   :  { %4038 = vsyncadd [#allocation3], 4294966272 }
  0x5f   :  { %4039 = dma.done.wait [#allocation5], 8208  }
  0x60   :  { %4040 = vsyncadd [#allocation5], 4294959088 }
  0x61   :  { %4041 = dma.done.wait [#allocation8], 2048  }
  0x62   :  { %4042 = vsyncadd [#allocation8], 4294965248 }
  0x63   :  { %4043 = dma.done.wait [#allocation11], 144  }
  0x64   :  { %4044 = vsyncadd [#allocation11], 4294967152 }
  0x65   :  { %4045 = dma.done.wait [#allocation14], 16  }
  0x66   :  { %4046 = vsyncadd [#allocation14], 4294967280  ;;  %v4059_v0 = vmov 0   ;;  %v261_v1 = vld [vmem:[%s5155_s1] sm:$0xff]  ;;  %s5188_s13 = sld [smem:[#allocation53_spill]]  ;;  %v262_v3 = vld [vmem:[%s5155_s1 + $0x8] sm:$0xff] }
  0x67   :  { %3796 = vset.pattern.permute.xlu1 %v4059_v0  ;;  %3795 = vset.pattern.permute.xlu0 %v4059_v0  ;;  %v264_v5 = vld [vmem:[%s5155_s1 + $0x18] sm:$0xff]  ;;  %v263_v6 = vld [vmem:[%s5155_s1 + $0x10] sm:$0xff]  ;;  %v2643_v9 = vld [vmem:[%s5157_s3 + $0x60] sm:$0xff]  ;;  %v5172_v59 = vmov 0.0  }
  0x68   :  { %278 = vperm.xlu1 %3796, %v261_v1   ;;  %v2645_v7 = vld [vmem:[%s5157_s3 + $0x70] sm:$0xff]  ;;  %v2646_v8 = vld [vmem:[%s5157_s3 + $0x78] sm:$0xff]  ;;  %v266_v10 = vld [vmem:[%s5155_s1 + $0x28] sm:$0xff]  ;;  %vm2659_vm2 = vcmp.gt.f32.partialorder %v2643_v9, 0.0 }
  0x69   :  { %v265_v11 = vld [vmem:[%s5155_s1 + $0x20] sm:$0xff]  ;;  %vm2661_vm0 = vcmp.gt.f32.partialorder %v2645_v7, 0.0  ;;  %vm2662_vm1 = vcmp.gt.f32.partialorder %v2646_v8, 0.0  ;;  %v2644_v12 = vld [vmem:[%s5157_s3 + $0x68] sm:$0xff]  ;;  %v2641_v13 = vld [vmem:[%s5157_s3 + $0x50] sm:$0xff]  ;;  %v4263_v29 = vsel %vm2659_vm2, 1, %v4059_v0 }
  0x6a   :  { %v2642_v14 = vld [vmem:[%s5157_s3 + $0x58] sm:$0xff]  ;;  %v2639_v15 = vld [vmem:[%s5157_s3 + $0x40] sm:$0xff]  ;;  %v2640_v16 = vld [vmem:[%s5157_s3 + $0x48] sm:$0xff]  ;;  %v4244_v21 = vsel %vm2661_vm0, 1, %v4059_v0  ;;  %v4247_v22 = vsel %vm2662_vm1, 1, %v4059_v0  ;;  %vm2660_vm3 = vcmp.gt.f32.partialorder %v2644_v12, 0.0 }
  0x6b   :  { %v2637_v17 = vld [vmem:[%s5157_s3 + $0x30] sm:$0xff]  ;;  %v2638_v18 = vld [vmem:[%s5157_s3 + $0x38] sm:$0xff]  ;;  %v2635_v19 = vld [vmem:[%s5157_s3 + $0x20] sm:$0xff]  ;;  %vm2657_vm4 = vcmp.gt.f32.partialorder %v2641_v13, 0.0  ;;  %vm2658_vm5 = vcmp.gt.f32.partialorder %v2642_v14, 0.0  ;;  %vm2655_vm6 = vcmp.gt.f32.partialorder %v2639_v15, 0.0 }
  0x6c   :  { %v155_v2 = vld [vmem:[%s5188_s13] sm:$0xff]  ;;  %v156_v4 = vld [vmem:[%s5188_s13 + $0x8] sm:$0xff]  ;;  %281 = vperm.xlu1 %3796, %v262_v3   ;;  %v2633_v23 = vld [vmem:[%s5157_s3 + $0x10] sm:$0xff]  ;;  %vm2656_vm7 = vcmp.gt.f32.partialorder %v2640_v16, 0.0  ;;  %vm2653_vm8 = vcmp.gt.f32.partialorder %v2637_v17, 0.0  ;;  %vm2654_vm9 = vcmp.gt.f32.partialorder %v2638_v18, 0.0 }
  0x6d   :  { %160 = vperm.xlu0 %3795, %v155_v2   ;;  %v2636_v20 = vld [vmem:[%s5157_s3 + $0x28] sm:$0xff]  ;;  %v2634_v24 = vld [vmem:[%s5157_s3 + $0x18] sm:$0xff]  ;;  %vm2651_vm10 = vcmp.gt.f32.partialorder %v2635_v19, 0.0  ;;  %v177_v26 = vld [vmem:[#allocation2 + $0x30] sm:$0xff]  ;;  %v4267_v30 = vsel %vm2660_vm3, 1, %v4059_v0  ;;  %vm2649_vm12 = vcmp.gt.f32.partialorder %v2633_v23, 0.0 }
  0x6e   :  { %vm2652_vm11 = vcmp.gt.f32.partialorder %v2636_v20, 0.0  ;;  %v178_v25 = vld [vmem:[#allocation2 + $0x38] sm:$0xff]  ;;  %v267_v28 = vld [vmem:[%s5155_s1 + $0x30] sm:$0xff]  ;;  %vm2650_vm13 = vcmp.gt.f32.partialorder %v2634_v24, 0.0  ;;  %v4271_v31 = vsel %vm2657_vm4, 1, %v4059_v0  ;;  %v4275_v32 = vsel %vm2658_vm5, 1, %v4059_v0 }
  0x6f   :  { %v268_v27 = vld [vmem:[%s5155_s1 + $0x38] sm:$0xff]  ;;  %3641 = vmatprep.subr.mxu0 %v178_v25  ;;  %v4279_v33 = vsel %vm2655_vm6, 1, %v4059_v0  ;;  %v4283_v34 = vsel %vm2656_vm7, 1, %v4059_v0  ;;  %v270_v36 = vld [vmem:[%s5155_s1 + $0x48] sm:$0xff]  ;;  %v269_v37 = vld [vmem:[%s5155_s1 + $0x40] sm:$0xff]  ;;  %v4296_v38 = vsel %vm2653_vm8, 1, %v4059_v0 }
  0x70   :  { %287 = vperm.xlu1 %3796, %v264_v5   ;;  %3642 = vmatpush3.msra.mxu0 %v178_v25  ;;  %v376_v35 = vld [vmem:[%s5160_s6 + $0x18] sm:$0xff]  ;;  %v4300_v39 = vsel %vm2654_vm9, 1, %v4059_v0  ;;  %v4304_v40 = vsel %vm2651_vm10, 1, %v4059_v0  ;;  %v4308_v41 = vsel %vm2652_vm11, 1, %v4059_v0  ;;  %v176_v42 = vld [vmem:[#allocation2 + $0x28] sm:$0xff]  ;;  %v375_v43 = vld [vmem:[%s5160_s6 + $0x10] sm:$0xff]  ;;  %v157_v5 = vlaneseq }
  0x71   :  { %163 = vperm.xlu0 %3795, %v156_v4   ;;  %3643 = vmatprep.subr.mxu0 %v177_v26  ;;  %v2665_v44 = vsel %vm2649_vm12, 1, %v4059_v0  ;;  %v2666_v45 = vsel %vm2650_vm13, 1, %v4059_v0  ;;  %v175_v46 = vld [vmem:[#allocation2 + $0x20] sm:$0xff]  ;;  %v374_v47 = vld [vmem:[%s5160_s6 + $0x8] sm:$0xff]  ;;  %v174_v48 = vld [vmem:[#allocation2 + $0x18] sm:$0xff]  ;;  %vm179_vm0 = vcmask 523264  }
  0x72   :  { %3660 = vmatprep.subr.mxu1 %v376_v35  ;;  %3644 = vmatpush3.msra.mxu0 %v177_v26  ;;  %v373_v49 = vld [vmem:[%s5160_s6] sm:$0xff]  ;;  %v272_v50 = vld [vmem:[%s5155_s1 + $0x58] sm:$0xff]  ;;  %v271_v51 = vld [vmem:[%s5155_s1 + $0x50] sm:$0xff]  ;;  %vm377_vm1 = vcmask 261120  }
  0x73   :  { %3661 = vmatpush3.msra.mxu1 %v376_v35  ;;  %3645 = vmatprep.subr.mxu0 %v176_v42  ;;  %v173_v52 = vld [vmem:[#allocation2 + $0x10] sm:$0xff]  ;;  %v274_v53 = vld [vmem:[%s5155_s1 + $0x68] sm:$0xff]  ;;  %v273_v54 = vld [vmem:[%s5155_s1 + $0x60] sm:$0xff] }
  0x74   :  { %293 = vperm.xlu1 %3796, %v266_v10   ;;  %3662 = vmatprep.subr.mxu1 %v375_v43  ;;  %v172_v55 = vld [vmem:[#allocation2 + $0x8] sm:$0xff]  ;;  %v171_v56 = vld [vmem:[#allocation2] sm:$0xff]  ;;  %v276_v57 = vld [vmem:[%s5155_s1 + $0x78] sm:$0xff] }
  0x75   :  { %284 = vperm.xlu0 %3795, %v263_v6   ;;  %3646 = vmatpush3.msra.mxu0 %v176_v42  ;;  %v275_v58 = vld [vmem:[%s5155_s1 + $0x70] sm:$0xff]  ;;  %v2631_v60 = vld [vmem:[%s5157_s3] sm:$0xff]  ;;  %v2632_v61 = vld [vmem:[%s5157_s3 + $0x8] sm:$0xff]  ;;  %v4369_v6 = vand.u32 127, %v157_v5 }
  0x76   :  { %3663 = vmatpush3.msra.mxu1 %v375_v43  ;;  %3647 = vmatprep.subr.mxu0 %v175_v46  ;;  %vm2647_vm14 = vcmp.gt.f32.partialorder %v2631_v60, 0.0  ;;  %vm2648_vm15 = vcmp.gt.f32.partialorder %v2632_v61, 0.0  ;;  %v710_v62 = vld [vmem:[%s5161_s7 + $0x1c0] sm:$0xff] }
  0x77   :  { %3664 = vmatprep.subr.mxu1 %v374_v47  ;;  %3648 = vmatpush3.msra.mxu0 %v175_v46  ;;  %v714_v63 = vld [vmem:[%s5161_s7 + $0x1e0] sm:$0xff]  ;;  %v2663_v1 = vsel %vm2647_vm14, 1, %v4059_v0  ;;  %v2664_v2 = vsel %vm2648_vm15, 1, %v4059_v0 }
  0x78   :  { %299 = vperm.xlu1 %3796, %v268_v27   ;;  %3665 = vmatpush3.msra.mxu1 %v374_v47  ;;  %v3225_v3 = vcombine.low %v710_v62, %v714_v63  ;;  %v3226_v4 = vcombine.high %v710_v62, %v714_v63  ;;  %v706_v12 = vld [vmem:[%s5161_s7 + $0x1a0] sm:$0xff] }
  0x79   :  { %290 = vperm.xlu0 %3795, %v265_v11   ;;  %3649 = vmatprep.subr.mxu0 %v174_v48  ;;  %v702_v11 = vld [vmem:[%s5161_s7 + $0x180] sm:$0xff] }
  0x7a   :  { %3666 = vmatprep.subr.mxu1 %v373_v49  ;;  %3650 = vmatpush3.msra.mxu0 %v174_v48  ;;  %v3218_v15 = vcombine.high %v702_v11, %v706_v12  ;;  %v694_v18 = vld [vmem:[%s5161_s7 + $0x140] sm:$0xff] }
  0x7b   :  { %3667 = vmatpush3.msra.mxu1 %v373_v49  ;;  %3651 = vmatprep.subr.mxu0 %v173_v52  ;;  %v698_v19 = vld [vmem:[%s5161_s7 + $0x160] sm:$0xff] }
  0x7c   :  { %305 = vperm.xlu1 %3796, %v270_v36   ;;  %3652 = vmatpush3.msra.mxu0 %v173_v52  ;;  %v3210_v25 = vcombine.high %v694_v18, %v698_v19  ;;  %v686_v26 = vld [vmem:[%s5161_s7 + $0x100] sm:$0xff] }
  0x7d   :  { %296 = vperm.xlu0 %3795, %v267_v28   ;;  %3653 = vmatprep.subr.mxu0 %v172_v55  ;;  %v690_v27 = vld [vmem:[%s5161_s7 + $0x120] sm:$0xff] }
  0x7e   :  { %3654 = vmatpush3.msra.mxu0 %v172_v55  ;;  %1080 = vmatprep.subr.bf16.mxu1 %v3226_v4  ;;  %v682_v35 = vld [vmem:[%s5161_s7 + $0xe0] sm:$0xff] }
  0x7f   :  { %3655 = vmatprep.subr.mxu0 %v171_v56  ;;  %v670_v42 = vld [vmem:[%s5161_s7 + $0x80] sm:$0xff] }
  0x80   :  { %311 = vperm.xlu1 %3796, %v272_v50   ;;  %3656 = vmatpush3.msra.mxu0 %v171_v56  ;;  %v674_v43 = vld [vmem:[%s5161_s7 + $0xa0] sm:$0xff] }
  0x81   :  { %302 = vperm.xlu0 %3795, %v269_v37   ;;  %3692 = vmatprep.subr.mxu0 %v5172_v59  ;;  %v3186_v49 = vcombine.high %v670_v42, %v674_v43  ;;  %v662_v50 = vld [vmem:[%s5161_s7 + $0x40] sm:$0xff] }
  0x84   :  { %317 = vperm.xlu1 %3796, %v274_v53  }
  0x85   :  { %308 = vperm.xlu0 %3795, %v271_v51   ;;  %v666_v51 = vld [vmem:[%s5161_s7 + $0x60] sm:$0xff] }
  0x86   :  { %v3177_v61 = vcombine.low %v662_v50, %v666_v51 }
  0x88   :  { %323 = vperm.xlu1 %3796, %v276_v57   ;;  %v3178_v57 = vcombine.high %v662_v50, %v666_v51 }
  0x89   :  { %314 = vperm.xlu0 %3795, %v273_v54   ;;  %v3185_v54 = vcombine.low %v670_v42, %v674_v43 }
  0x8c   :  { %2722 = vperm.xlu1 %3796, %v4244_v21  }
  0x8d   :  { %320 = vperm.xlu0 %3795, %v275_v58  }
  0x90   :  { %2716 = vperm.xlu1 %3796, %v4263_v29  }
  0x91   :  { %2725 = vperm.xlu0 %3795, %v4247_v22   ;;  %v3217_v22 = vcombine.low %v702_v11, %v706_v12  ;;  %v716_v11 = vld [vmem:[%s5161_s7 + $0x1f0] sm:$0xff] }
  0x94   :  { %2710 = vperm.xlu1 %3796, %v4271_v31  }
  0x95   :  { %2719 = vperm.xlu0 %3795, %v4267_v30   ;;  %v3209_v30 = vcombine.low %v694_v18, %v698_v19 }
  0x98   :  { %2704 = vperm.xlu1 %3796, %v4279_v33   ;;  %v3202_v33 = vcombine.high %v686_v26, %v690_v27 }
  0x99   :  { %2713 = vperm.xlu0 %3795, %v4275_v32  }
  0x9c   :  { %2698 = vperm.xlu1 %3796, %v4296_v38   ;;  %v3201_v38 = vcombine.low %v686_v26, %v690_v27 }
  0x9d   :  { %2707 = vperm.xlu0 %3795, %v4283_v34   ;;  %v678_v34 = vld [vmem:[%s5161_s7 + $0xc0] sm:$0xff] }
  0x9e   :  { %v3193_v46 = vcombine.low %v678_v34, %v682_v35 }
  0xa0   :  { %2692 = vperm.xlu1 %3796, %v4304_v40  }
  0xa1   :  { %2701 = vperm.xlu0 %3795, %v4300_v39  }
  0xa4   :  { %2686 = vperm.xlu1 %3796, %v2665_v44  }
  0xa5   :  { %2695 = vperm.xlu0 %3795, %v4308_v41   ;;  %v3194_v41 = vcombine.high %v678_v34, %v682_v35  ;;  %v696_v34 = vld [vmem:[%s5161_s7 + $0x150] sm:$0xff] }
  0xa6   :  { %v700_v35 = vld [vmem:[%s5161_s7 + $0x170] sm:$0xff] }
  0xa8   :  { %2680 = vperm.xlu1 %3796, %v2663_v1  }
  0xa9   :  { %2689 = vperm.xlu0 %3795, %v2666_v45  }
  0xad   :  { %2683 = vperm.xlu0 %3795, %v2664_v2  }
  0xe3   :  { %v279_v7 = vpop.permute.xlu1 %278 }
  0xe4   :  { %vm325_vm2 = vcmp.eq.s32.totalorder %v279_v7, %v4369_v6  ;;  %v654_v7 = vld [vmem:[%s5161_s7] sm:$0xff] }
  0xe5   :  { %v3136_v10 = vsel %vm325_vm2, 1.0, %v5172_v59 }
  0xe6   :  { %3668 = vmatprep.mubr.msk.f32.mxu1 %vm377_vm1, %v3136_v10  ;;  %v712_v10 = vld [vmem:[%s5161_s7 + $0x1d0] sm:$0xff] }
  0xe7   :  { %v282_v13 = vpop.permute.xlu1 %281  ;;  %v3230_v12 = vcombine.high %v712_v10, %v716_v11 }
  0xe8   :  { %v161_v8 = vpop.permute.xlu0 %160  ;;  %vm326_vm4 = vcmp.eq.s32.totalorder %v282_v13, %v4369_v6  ;;  %v3229_v13 = vcombine.low %v712_v10, %v716_v11  ;;  %v664_v11 = vld [vmem:[%s5161_s7 + $0x50] sm:$0xff] }
  0xe9   :  { %vm165_vm3 = vcmp.eq.s32.totalorder %v161_v8, %v4369_v6  ;;  %v3137_v16 = vsel %vm326_vm4, 1.0, %v5172_v59  ;;  %v658_v8 = vld [vmem:[%s5161_s7 + $0x20] sm:$0xff] }
  0xea   :  { %v3132_v9 = vsel %vm165_vm3, 1.0, %v5172_v59  ;;  %3669 = vmatmul.mubr.msk.f32.vlgmr.msra.gmra.mxu1 %vm377_vm1, %v3137_v16  ;;  %v703_v16 = vld [vmem:[%s5161_s7 + $0x188] sm:$0xff] }
  0xeb   :  { %3657 = vmatprep.mubr.msk.f32.mxu0 %vm179_vm0, %v3132_v9  ;;  %v288_v20 = vpop.permute.xlu1 %287  ;;  %1081 = vmatpush1.bf16.msra.mxu1 %v3225_v3  ;;  %v3169_v9 = vcombine.low %v654_v7, %v658_v8 }
  0xec   :  { %v164_v14 = vpop.permute.xlu0 %163  ;;  %vm328_vm6 = vcmp.eq.s32.totalorder %v288_v20, %v4369_v6  ;;  %1082 = vmatprep.subr.bf16.mxu1 %v3218_v15  ;;  %v715_v15 = vld [vmem:[%s5161_s7 + $0x1e8] sm:$0xff] }
  0xed   :  { %vm166_vm5 = vcmp.eq.s32.totalorder %v164_v14, %v4369_v6  ;;  %v3139_v23 = vsel %vm328_vm6, 1.0, %v5172_v59  ;;  %v711_v14 = vld [vmem:[%s5161_s7 + $0x1c8] sm:$0xff] }
  0xee   :  { %v3133_v17 = vsel %vm166_vm5, 1.0, %v5172_v59  ;;  %vm4061_vm5 = vmmov 0   ;;  %v3228_v20 = vcombine.high %v711_v14, %v715_v15 }
  0xef   :  { %3658 = vmatmul.mubr.msk.f32.vlgmr.msra.gmra.mxu0 %vm179_vm0, %v3133_v17  ;;  %v294_v28 = vpop.permute.xlu1 %293  ;;  %1083 = vmatpush1.bf16.msra.mxu1 %v3217_v22  ;;  %v707_v17 = vld [vmem:[%s5161_s7 + $0x1a8] sm:$0xff]  ;;  %v3227_v22 = vcombine.low %v711_v14, %v715_v15 }
  0xf0   :  { %v285_v21 = vpop.permute.xlu0 %284  ;;  %vm330_vm8 = vcmp.eq.s32.totalorder %v294_v28, %v4369_v6  ;;  %1084 = vmatprep.subr.bf16.mxu1 %v3210_v25  ;;  %3696 = vmatprep.mubr.msk.f32.mxu0 %vm4061_vm5, %v5172_v59  ;;  %v3220_v27 = vcombine.high %v703_v16, %v707_v17  ;;  %v655_v14 = vld [vmem:[%s5161_s7 + $0x8] sm:$0xff] }
  0xf1   :  { %vm327_vm7 = vcmp.eq.s32.totalorder %v285_v21, %v4369_v6  ;;  %v3141_v31 = vsel %vm330_vm8, 1.0, %v5172_v59  ;;  %v571_v21 = vld [vmem:[%s5156_s2] sm:$0xff]  ;;  %v659_v15 = vld [vmem:[%s5161_s7 + $0x28] sm:$0xff] }
  0xf2   :  { %v3138_v24 = vsel %vm327_vm7, 1.0, %v5172_v59 }
  0xf3   :  { %3671 = vmatprep.mubr.msk.f32.mxu1 %vm377_vm1, %v3138_v24  ;;  %v300_v36 = vpop.permute.xlu1 %299  ;;  %1085 = vmatpush1.bf16.msra.mxu1 %v3209_v30  ;;  %v708_v24 = vld [vmem:[%s5161_s7 + $0x1b0] sm:$0xff]  ;;  %v699_v30 = vld [vmem:[%s5161_s7 + $0x168] sm:$0xff] }
  0xf4   :  { %3672 = vmatmul.mubr.msk.f32.gmra.mxu1 %vm377_vm1, %v3139_v23  ;;  %v291_v29 = vpop.permute.xlu0 %290  ;;  %vm332_vm10 = vcmp.eq.s32.totalorder %v300_v36, %v4369_v6  ;;  %1086 = vmatprep.subr.bf16.mxu1 %v3202_v33  ;;  %v704_v23 = vld [vmem:[%s5161_s7 + $0x190] sm:$0xff]  ;;  %v3219_v33 = vcombine.low %v703_v16, %v707_v17 }
  0xf5   :  { %vm329_vm9 = vcmp.eq.s32.totalorder %v291_v29, %v4369_v6  ;;  %v3143_v39 = vsel %vm332_vm10, 1.0, %v5172_v59  ;;  %v695_v29 = vld [vmem:[%s5161_s7 + $0x148] sm:$0xff] }
  0xf6   :  { %v3140_v32 = vsel %vm329_vm9, 1.0, %v5172_v59  ;;  %v3212_v36 = vcombine.high %v695_v29, %v699_v30  ;;  %v3211_v43 = vcombine.low %v695_v29, %v699_v30  ;;  %v717_v29 = vld [vmem:[%s5161_s7 + $0x1f8] sm:$0xff] }
  0xf7   :  { %3674 = vmatprep.mubr.msk.f32.mxu1 %vm377_vm1, %v3140_v32  ;;  %v306_v44 = vpop.permute.xlu1 %305  ;;  %1087 = vmatpush1.bf16.msra.mxu1 %v3201_v38  ;;  %v691_v38 = vld [vmem:[%s5161_s7 + $0x128] sm:$0xff] }
  0xf8   :  { %3675 = vmatmul.mubr.msk.f32.gmra.mxu1 %vm377_vm1, %v3141_v31  ;;  %v297_v37 = vpop.permute.xlu0 %296  ;;  %vm334_vm12 = vcmp.eq.s32.totalorder %v306_v44, %v4369_v6  ;;  %1088 = vmatprep.subr.bf16.mxu1 %v3194_v41  ;;  %v3222_v31 = vcombine.high %v704_v23, %v708_v24  ;;  %v3214_v41 = vcombine.high %v696_v34, %v700_v35  ;;  %v688_v44 = vld [vmem:[%s5161_s7 + $0x110] sm:$0xff] }
  0xf9   :  { %vm331_vm11 = vcmp.eq.s32.totalorder %v297_v37, %v4369_v6  ;;  %v3145_v47 = vsel %vm334_vm12, 1.0, %v5172_v59  ;;  %v687_v37 = vld [vmem:[%s5161_s7 + $0x108] sm:$0xff] }
  0xfa   :  { %v3142_v40 = vsel %vm331_vm11, 1.0, %v5172_v59 }
  0xfb   :  { %3677 = vmatprep.mubr.msk.f32.mxu1 %vm377_vm1, %v3142_v40  ;;  %v312_v52 = vpop.permute.xlu1 %311  ;;  %1089 = vmatpush1.bf16.msra.mxu1 %v3193_v46  ;;  %v3204_v46 = vcombine.high %v687_v37, %v691_v38 }
  0xfc   :  { %3678 = vmatmul.mubr.msk.f32.gmra.mxu1 %vm377_vm1, %v3143_v39  ;;  %v303_v45 = vpop.permute.xlu0 %302  ;;  %vm336_vm14 = vcmp.eq.s32.totalorder %v312_v52, %v4369_v6  ;;  %1090 = vmatprep.subr.bf16.mxu1 %v3186_v49  ;;  %v3221_v39 = vcombine.low %v704_v23, %v708_v24  ;;  %v3213_v49 = vcombine.low %v696_v34, %v700_v35  ;;  %v660_v23 = vld [vmem:[%s5161_s7 + $0x30] sm:$0xff] }
  0xfd   :  { %vm333_vm13 = vcmp.eq.s32.totalorder %v303_v45, %v4369_v6  ;;  %v3147_v55 = vsel %vm336_vm14, 1.0, %v5172_v59  ;;  %v692_v45 = vld [vmem:[%s5161_s7 + $0x130] sm:$0xff]  ;;  %v3203_v52 = vcombine.low %v687_v37, %v691_v38  ;;  %v3172_v24 = vcombine.high %v655_v14, %v659_v15  ;;  %v705_v37 = vld [vmem:[%s5161_s7 + $0x198] sm:$0xff] }
  0xfe   :  { %v3144_v48 = vsel %vm333_vm13, 1.0, %v5172_v59  ;;  %v3206_v51 = vcombine.high %v688_v44, %v692_v45  ;;  %v709_v38 = vld [vmem:[%s5161_s7 + $0x1b8] sm:$0xff] }
  0xff   :  { %3680 = vmatprep.mubr.msk.f32.mxu1 %vm377_vm1, %v3144_v48  ;;  %v318_v58 = vpop.permute.xlu1 %317  ;;  %1091 = vmatpush1.bf16.msra.mxu1 %v3185_v54  ;;  %v683_v48 = vld [vmem:[%s5161_s7 + $0xe8] sm:$0xff]  ;;  %v684_v54 = vld [vmem:[%s5161_s7 + $0xf0] sm:$0xff] }
 0x100   :  { %3681 = vmatmul.mubr.msk.f32.gmra.mxu1 %vm377_vm1, %v3145_v47  ;;  %v309_v53 = vpop.permute.xlu0 %308  ;;  %vm338_vm0 = vcmp.eq.s32.totalorder %v318_v58, %v4369_v6  ;;  %1092 = vmatprep.subr.bf16.mxu1 %v3178_v57  ;;  %v679_v47 = vld [vmem:[%s5161_s7 + $0xc8] sm:$0xff]  ;;  %v3205_v58 = vcombine.low %v688_v44, %v692_v45  ;;  %v3224_v44 = vcombine.high %v705_v37, %v709_v38 }
 0x101   :  { %vm335_vm15 = vcmp.eq.s32.totalorder %v309_v53, %v4369_v6  ;;  %v3149_v62 = vsel %vm338_vm0, 1.0, %v5172_v59  ;;  %v680_v53 = vld [vmem:[%s5161_s7 + $0xd0] sm:$0xff]  ;;  %v675_v57 = vld [vmem:[%s5161_s7 + $0xa8] sm:$0xff] }
 0x102   :  { %v3146_v56 = vsel %vm335_vm15, 1.0, %v5172_v59 }
 0x103   :  { %3683 = vmatprep.mubr.msk.f32.mxu1 %vm377_vm1, %v3146_v56  ;;  %v324_v1 = vpop.permute.xlu1 %323  ;;  %1093 = vmatpush1.bf16.msra.mxu1 %v3177_v61  ;;  %v671_v56 = vld [vmem:[%s5161_s7 + $0x88] sm:$0xff]  ;;  %v3198_v61 = vcombine.high %v680_v53, %v684_v54 }
 0x104   :  { %3684 = vmatmul.mubr.msk.f32.gmra.mxu1 %vm377_vm1, %v3147_v55  ;;  %v315_v60 = vpop.permute.xlu0 %314  ;;  %vm340_vm3 = vcmp.eq.s32.totalorder %v324_v1, %v4369_v6  ;;  %v3196_v55 = vcombine.high %v679_v47, %v683_v48  ;;  %v672_v1 = vld [vmem:[%s5161_s7 + $0x90] sm:$0xff]  ;;  %v3187_v10 = vcombine.low %v671_v56, %v675_v57 }
 0x105   :  { %vm337_vm2 = vcmp.eq.s32.totalorder %v315_v60, %v4369_v6  ;;  %v3151_v3 = vsel %vm340_vm3, 1.0, %v5172_v59 }
 0x106   :  { %v3148_v63 = vsel %vm337_vm2, 1.0, %v5172_v59 }
 0x107   :  { %3686 = vmatprep.mubr.msk.f32.mxu1 %vm377_vm1, %v3148_v63  ;;  %v3195_v63 = vcombine.low %v679_v47, %v683_v48  ;;  %v701_v47 = vld [vmem:[%s5161_s7 + $0x178] sm:$0xff]  ;;  %v3223_v48 = vcombine.low %v705_v37, %v709_v38 }
 0x108   :  { %3687 = vmatmul.mubr.msk.f32.gmra.mxu1 %vm377_vm1, %v3149_v62  ;;  %v321_v2 = vpop.permute.xlu0 %320  ;;  %v3805_v37 = vld [vmem:[#allocation4 + $0x58] sm:$0xff]  }
 0x109   :  { %vm339_vm4 = vcmp.eq.s32.totalorder %v321_v2, %v4369_v6  ;;  %v3170_v6 = vcombine.high %v654_v7, %v658_v8  ;;  %v676_v2 = vld [vmem:[%s5161_s7 + $0xb0] sm:$0xff]  ;;  %v667_v7 = vld [vmem:[%s5161_s7 + $0x68] sm:$0xff]  ;;  %v3197_v8 = vcombine.low %v680_v53, %v684_v54  ;;  %v693_v53 = vld [vmem:[%s5161_s7 + $0x138] sm:$0xff] }
 0x10a   :  { %v3150_v4 = vsel %vm339_vm4, 1.0, %v5172_v59  ;;  %v3189_v16 = vcombine.low %v672_v1, %v676_v2  ;;  %v3813_v38 = vld [vmem:[#allocation4 + $0xf8] sm:$0xff]  }
 0x10b   :  { %3689 = vmatprep.mubr.msk.f32.mxu1 %vm377_vm1, %v3150_v4  ;;  %1094 = vmatprep.subr.bf16.mxu1 %v3170_v6  ;;  %v663_v4 = vld [vmem:[%s5161_s7 + $0x48] sm:$0xff] }
 0x10c   :  { %3690 = vmatmul.mubr.msk.f32.gmra.mxu1 %vm377_vm1, %v3151_v3  ;;  %vm572_vm1 = vcmask 130048   ;;  %v3188_v3 = vcombine.high %v671_v56, %v675_v57 }
 0x10d   :  { %1112 = vmatprep.mubr.bf16.mxu1 %v4059_v0  ;;  %1095 = vmatpush1.bf16.msra.mxu1 %v3169_v9  ;;  %v3190_v9 = vcombine.high %v672_v1, %v676_v2 }
 0x10e   :  { %1306 = vmatprep.subr.bf16.mxu1 %v3230_v12  ;;  %v668_v12 = vld [vmem:[%s5161_s7 + $0x70] sm:$0xff] }
 0x1aa   :  { %v4488_v19 = vpop.f32.mrf.mxu1 }
 0x1ab   :  { %5189 = vst [vmem:[#allocation20_spill] sm:$0xff] %v4488_v19 }
 0x1ac   :  { %v4499_v26 = vpop.f32.mrf.mxu1 }
 0x1ad   :  { %5190 = vst [vmem:[#allocation21_spill] sm:$0xff] %v4499_v26  ;;  %v4504_v28 = vpack.c.bf16 %v4488_v19, %v4499_v26 }
 0x1af   :  { %v3659_v18 = vpop.f32.mrf.mxu0  ;;  %1113 = vmatmul.mubr.bf16.vlgmr.msra.gmra.mxu1 %v4504_v28 }
 0x1b0   :  { %3693 = vmatpush3.msra.mxu0 %v3659_v18  ;;  %1122 = vmatprep.mubr.bf16.mxu1 %v4059_v0  ;;  %v3182_v18 = vcombine.high %v664_v11, %v668_v12 }
 0x1b1   :  { %v252_v25 = vpop.f32.mrf.mxu0  ;;  %3694 = vmatprep.subr.mxu0 %v5172_v59  ;;  %1307 = vmatpush1.bf16.msra.mxu1 %v3229_v13  ;;  %v3180_v13 = vcombine.high %v663_v4, %v667_v7 }
 0x1b2   :  { %3695 = vmatpush3.msra.mxu0 %v252_v25  ;;  %1308 = vmatprep.subr.bf16.mxu1 %v3222_v31  ;;  %v3181_v25 = vcombine.low %v664_v11, %v668_v12  ;;  %v665_v11 = vld [vmem:[%s5161_s7 + $0x58] sm:$0xff] }
 0x1b3   :  { %3697 = vmatmul.mubr.msk.f32.vlgmr.msra.gmra.mxu0 %vm572_vm1, %v571_v21  ;;  %1193 = vmatprep.subr.bf16.mxu0 %v3228_v20  ;;  %v3179_v21 = vcombine.low %v663_v4, %v667_v7  ;;  %v677_v4 = vld [vmem:[%s5161_s7 + $0xb8] sm:$0xff] }
 0x1b4   :  { %v4512_v32 = vpop.f32.mrf.mxu1  ;;  %1194 = vmatpush1.bf16.msra.mxu0 %v3227_v22  ;;  %1225 = vmatprep.mubr.bf16.mxu0 %v4059_v0  ;;  %v656_v22 = vld [vmem:[%s5161_s7 + $0x10] sm:$0xff]  ;;  %v669_v12 = vld [vmem:[%s5161_s7 + $0x78] sm:$0xff] }
 0x1b5   :  { %5191 = vst [vmem:[#allocation22_spill] sm:$0xff] %v4512_v32  ;;  %1195 = vmatprep.subr.bf16.mxu0 %v3220_v27  ;;  %1309 = vmatpush1.bf16.msra.mxu1 %v3221_v39  ;;  %v713_v27 = vld [vmem:[%s5161_s7 + $0x1d8] sm:$0xff]  ;;  %v3174_v31 = vcombine.high %v656_v22, %v660_v23  ;;  %v3173_v35 = vcombine.low %v656_v22, %v660_v23 }
 0x1b6   :  { %v4529_v40 = vpop.f32.mrf.mxu1  ;;  %1310 = vmatprep.subr.bf16.mxu1 %v3214_v41  ;;  %v3232_v34 = vcombine.high %v713_v27, %v717_v29  ;;  %v3797_v39 = vld [vmem:[#allocation4 + $0x78] sm:$0xff]   ;;  %v3231_v41 = vcombine.low %v713_v27, %v717_v29  ;;  %v3799_v27 = vld [vmem:[#allocation4 + $0x70] sm:$0xff]  }
 0x1b7   :  { %5192 = vst [vmem:[#allocation23_spill] sm:$0xff] %v4529_v40  ;;  %v4533_v42 = vpack.c.bf16 %v4512_v32, %v4529_v40  ;;  %v3800_v29 = vld [vmem:[#allocation4 + $0x30] sm:$0xff]   ;;  %v2726_v32 = vpop.permute.xlu0 %2725 }
 0x1b8   :  { %1196 = vmatpush1.bf16.msra.mxu0 %v3219_v33  ;;  %v4547_v50 = vpop.f32.mrf.mxu1  ;;  %v3171_v33 = vcombine.low %v655_v14, %v659_v15  ;;  %v3184_v14 = vcombine.high %v665_v11, %v669_v12  ;;  %vm2742_vm6 = vcmp.eq.s32.totalorder %v2726_v32, 1 }
 0x1b9   :  { %1197 = vmatprep.subr.bf16.mxu0 %v3212_v36  ;;  %5193 = vst [vmem:[#allocation24_spill] sm:$0xff] %v4547_v50  ;;  %1123 = vmatmul.mubr.bf16.gmra.mxu1 %v4533_v42 }
 0x1ba   :  { %1132 = vmatprep.mubr.bf16.mxu1 %v4059_v0  ;;  %1311 = vmatpush1.bf16.msra.mxu1 %v3213_v49  ;;  %v4563_v60 = vpop.f32.mrf.mxu1 }
 0x1bb   :  { %5194 = vst [vmem:[#allocation25_spill] sm:$0xff] %v4563_v60  ;;  %1312 = vmatprep.subr.bf16.mxu1 %v3206_v51  ;;  %v4567_v62 = vpack.c.bf16 %v4547_v50, %v4563_v60  ;;  %v2723_v60 = vpop.permute.xlu1 %2722 }
 0x1bc   :  { %1198 = vmatpush1.bf16.msra.mxu0 %v3211_v43  ;;  %v4581_v6 = vpop.f32.mrf.mxu1  ;;  %vm2741_vm7 = vcmp.eq.s32.totalorder %v2723_v60, 1 }
 0x1bd   :  { %1199 = vmatprep.subr.bf16.mxu0 %v3204_v46  ;;  %5195 = vst [vmem:[#allocation26_spill] sm:$0xff] %v4581_v6  ;;  %v697_v46 = vld [vmem:[%s5161_s7 + $0x158] sm:$0xff] }
 0x1be   :  { %1313 = vmatpush1.bf16.msra.mxu1 %v3205_v58  ;;  %v4597_v17 = vpop.f32.mrf.mxu1  ;;  %v3216_v49 = vcombine.high %v697_v46, %v701_v47  ;;  %v3215_v54 = vcombine.low %v697_v46, %v701_v47  ;;  %v681_v58 = vld [vmem:[%s5161_s7 + $0xd8] sm:$0xff]  ;;  %v3809_v46 = vld [vmem:[#allocation4 + $0x48] sm:$0xff]  }
 0x1bf   :  { %1314 = vmatprep.subr.bf16.mxu1 %v3198_v61  ;;  %5196 = vst [vmem:[#allocation27_spill] sm:$0xff] %v4597_v17  ;;  %v4601_v20 = vpack.c.bf16 %v4581_v6, %v4597_v17  ;;  %v685_v61 = vld [vmem:[%s5161_s7 + $0xf8] sm:$0xff]  ;;  %v3810_v47 = vld [vmem:[#allocation4 + $0x8] sm:$0xff]  }
 0x1c0   :  { %1200 = vmatpush1.bf16.msra.mxu0 %v3203_v52  ;;  %v4615_v30 = vpop.f32.mrf.mxu1  ;;  %v689_v52 = vld [vmem:[%s5161_s7 + $0x118] sm:$0xff]  ;;  %v3200_v1 = vcombine.high %v681_v58, %v685_v61  ;;  %v3199_v7 = vcombine.low %v681_v58, %v685_v61  ;;  %v3818_v58 = vld [vmem:[#allocation4 + $0xa8] sm:$0xff]   ;;  %v3819_v61 = vld [vmem:[#allocation4 + $0xe0] sm:$0xff]  }
 0x1c1   :  { %1201 = vmatprep.subr.bf16.mxu0 %v3196_v55  ;;  %1133 = vmatmul.mubr.bf16.gmra.mxu1 %v4567_v62  ;;  %5197 = vst [vmem:[#allocation28_spill] sm:$0xff] %v4615_v30  ;;  %v3208_v56 = vcombine.high %v689_v52, %v693_v53 }
 0x1c2   :  { %1142 = vmatprep.mubr.bf16.mxu1 %v4059_v0  ;;  %1315 = vmatpush1.bf16.msra.mxu1 %v3197_v8  ;;  %v4619_v36 = vpop.f32.mrf.mxu1 }
 0x1c3   :  { %1316 = vmatprep.subr.bf16.mxu1 %v3190_v9  ;;  %5198 = vst [vmem:[#allocation29_spill] sm:$0xff] %v4619_v36  ;;  %v4629_v43 = vpack.c.bf16 %v4615_v30, %v4619_v36  ;;  %v2720_v36 = vpop.permute.xlu0 %2719 }
 0x1c4   :  { %1202 = vmatpush1.bf16.msra.mxu0 %v3195_v63  ;;  %v4631_v45 = vpop.f32.mrf.mxu1  ;;  %v3207_v63 = vcombine.low %v689_v52, %v693_v53  ;;  %v3814_v52 = vld [vmem:[#allocation4 + $0xb8] sm:$0xff]   ;;  %v3815_v53 = vld [vmem:[#allocation4 + $0xf0] sm:$0xff]   ;;  %vm2740_vm8 = vcmp.eq.s32.totalorder %v2720_v36, 1 }
 0x1c5   :  { %1203 = vmatprep.subr.bf16.mxu0 %v3188_v3  ;;  %5199 = vst [vmem:[#allocation30_spill] sm:$0xff] %v4631_v45  ;;  %v673_v3 = vld [vmem:[%s5161_s7 + $0x98] sm:$0xff] }
 0x1c6   :  { %1317 = vmatpush1.bf16.msra.mxu1 %v3189_v16  ;;  %v4643_v51 = vpop.f32.mrf.mxu1  ;;  %v3192_v9 = vcombine.high %v673_v3, %v677_v4  ;;  %v657_v16 = vld [vmem:[%s5161_s7 + $0x18] sm:$0xff] }
 0x1c7   :  { %1318 = vmatprep.subr.bf16.mxu1 %v3182_v18  ;;  %5200 = vst [vmem:[#allocation31_spill] sm:$0xff] %v4643_v51  ;;  %v4653_v55 = vpack.c.bf16 %v4631_v45, %v4643_v51  ;;  %v661_v18 = vld [vmem:[%s5161_s7 + $0x38] sm:$0xff] }
 0x1c8   :  { %1204 = vmatpush1.bf16.msra.mxu0 %v3187_v10  ;;  %v4655_v57 = vpop.f32.mrf.mxu1  ;;  %v3176_v23 = vcombine.high %v657_v16, %v661_v18 }
 0x1c9   :  { %1205 = vmatprep.subr.bf16.mxu0 %v3180_v13  ;;  %1143 = vmatmul.mubr.bf16.gmra.mxu1 %v4601_v20  ;;  %v3191_v13 = vcombine.low %v673_v3, %v677_v4  ;;  %v3822_v3 = vld [vmem:[#allocation4 + $0x98] sm:$0xff]   ;;  %v3823_v4 = vld [vmem:[#allocation4 + $0xd0] sm:$0xff]  }
 0x1ca   :  { %1152 = vmatprep.mubr.bf16.mxu1 %v4059_v0  ;;  %1319 = vmatpush1.bf16.msra.mxu1 %v3181_v25  ;;  %v4667_v2 = vpop.f32.mrf.mxu1  ;;  %v3798_v25 = vld [vmem:[#allocation4 + $0x38] sm:$0xff]  }
 0x1cb   :  { %1320 = vmatprep.subr.bf16.mxu1 %v3174_v31  ;;  %5201 = vst [vmem:[#allocation32_spill] sm:$0xff] %v4667_v2  ;;  %v4677_v8 = vpack.c.bf16 %v4655_v57, %v4667_v2  ;;  %v3801_v31 = vld [vmem:[#allocation4 + $0x68] sm:$0xff]  }
 0x1cc   :  { %1206 = vmatpush1.bf16.msra.mxu0 %v3179_v21  ;;  %v4679_v10 = vpop.f32.mrf.mxu1  ;;  %v3183_v21 = vcombine.low %v665_v11, %v669_v12  ;;  %v3827_v11 = vld [vmem:[#allocation4 + $0xc0] sm:$0xff]   ;;  %v3845_v12 = vld [vmem:[#allocation4 + $0x1f8] sm:$0xff]  }
 0x1cd   :  { %1207 = vmatprep.subr.bf16.mxu0 %v3172_v24  ;;  %v3175_v24 = vcombine.low %v657_v16, %v661_v18 }
 0x1ce   :  { %1321 = vmatpush1.bf16.msra.mxu1 %v3173_v35  ;;  %v4691_v15 = vpop.f32.mrf.mxu1  ;;  %v3804_v35 = vld [vmem:[#allocation4 + $0x20] sm:$0xff]  }
 0x1cf   :  { %3348 = vmatprep.subr.bf16.mxu1 %v3797_v39  ;;  %v4701_v22 = vpack.c.bf16 %v4679_v10, %v4691_v15  ;;  %v3806_v39 = vld [vmem:[#allocation4 + $0x18] sm:$0xff]  }
 0x1d0   :  { %1208 = vmatpush1.bf16.msra.mxu0 %v3171_v33  ;;  %v3802_v33 = vld [vmem:[#allocation4 + $0x28] sm:$0xff]  }
 0x1d1   :  { %1419 = vmatprep.subr.bf16.mxu0 %v3232_v34  ;;  %1153 = vmatmul.mubr.bf16.gmra.mxu1 %v4629_v43  ;;  %v3803_v34 = vld [vmem:[#allocation4 + $0x60] sm:$0xff]  }
 0x1d2   :  { %1162 = vmatprep.mubr.bf16.mxu1 %v4059_v0 }
 0x1d3   :  { %1226 = vmatmul.mubr.bf16.vlgmr.msra.gmra.mxu0 %v4504_v28 }
 0x1d4   :  { %1235 = vmatprep.mubr.bf16.mxu0 %v4059_v0  ;;  %1420 = vmatpush1.bf16.msra.mxu0 %v3231_v41  ;;  %v3807_v41 = vld [vmem:[#allocation4 + $0x50] sm:$0xff]  }
 0x1d5   :  { %1421 = vmatprep.subr.bf16.mxu0 %v3224_v44  ;;  %v3808_v44 = vld [vmem:[#allocation4 + $0x10] sm:$0xff]  }
 0x1d8   :  { %1422 = vmatpush1.bf16.msra.mxu0 %v3223_v48  ;;  %v3811_v48 = vld [vmem:[#allocation4 + $0x40] sm:$0xff]  }
 0x1d9   :  { %1423 = vmatprep.subr.bf16.mxu0 %v3216_v49  ;;  %1163 = vmatmul.mubr.bf16.gmra.mxu1 %v4653_v55  ;;  %v3812_v49 = vld [vmem:[#allocation4] sm:$0xff]  }
 0x1da   :  { %1172 = vmatprep.mubr.bf16.mxu1 %v4059_v0 }
 0x1db   :  { %1236 = vmatmul.mubr.bf16.gmra.mxu0 %v4533_v42 }
 0x1dc   :  { %1245 = vmatprep.mubr.bf16.mxu0 %v4059_v0  ;;  %1424 = vmatpush1.bf16.msra.mxu0 %v3215_v54  ;;  %v3816_v54 = vld [vmem:[#allocation4 + $0xb0] sm:$0xff]  }
 0x1dd   :  { %1425 = vmatprep.subr.bf16.mxu0 %v3208_v56  ;;  %v3817_v56 = vld [vmem:[#allocation4 + $0xe8] sm:$0xff]  }
 0x1e0   :  { %1426 = vmatpush1.bf16.msra.mxu0 %v3207_v63  ;;  %v3821_v63 = vld [vmem:[#allocation4 + $0xd8] sm:$0xff]  }
 0x1e1   :  { %1427 = vmatprep.subr.bf16.mxu0 %v3200_v1  ;;  %1173 = vmatmul.mubr.bf16.gmra.mxu1 %v4677_v8  ;;  %v3829_v1 = vld [vmem:[#allocation4 + $0x178] sm:$0xff]  }
 0x1e2   :  { %1182 = vmatprep.mubr.bf16.mxu1 %v4059_v0 }
 0x1e3   :  { %1246 = vmatmul.mubr.bf16.gmra.mxu0 %v4567_v62 }
 0x1e4   :  { %1255 = vmatprep.mubr.bf16.mxu0 %v4059_v0  ;;  %1428 = vmatpush1.bf16.msra.mxu0 %v3199_v7  ;;  %v3825_v7 = vld [vmem:[#allocation4 + $0xc8] sm:$0xff]  }
 0x1e5   :  { %1429 = vmatprep.subr.bf16.mxu0 %v3192_v9  ;;  %v3826_v9 = vld [vmem:[#allocation4 + $0x88] sm:$0xff]  }
 0x1e8   :  { %1430 = vmatpush1.bf16.msra.mxu0 %v3191_v13 }
 0x1e9   :  { %1431 = vmatprep.subr.bf16.mxu0 %v3184_v14  ;;  %1183 = vmatmul.mubr.bf16.gmra.mxu1 %v4701_v22 }
 0x1ea   :  { %1338 = vmatprep.mubr.bf16.mxu1 %v4059_v0 }
 0x1eb   :  { %1256 = vmatmul.mubr.bf16.gmra.mxu0 %v4601_v20 }
 0x1ec   :  { %1265 = vmatprep.mubr.bf16.mxu0 %v4059_v0  ;;  %1432 = vmatpush1.bf16.msra.mxu0 %v3183_v21 }
 0x1ed   :  { %1433 = vmatprep.subr.bf16.mxu0 %v3176_v23 }
 0x1f0   :  { %1434 = vmatpush1.bf16.msra.mxu0 %v3175_v24 }
 0x1f1   :  { %1339 = vmatmul.mubr.bf16.vlgmr.msra.gmra.mxu1 %v4504_v28  ;;  %3412 = vmatprep.subr.bf16.mxu0 %v3813_v38 }
 0x1f2   :  { %1348 = vmatprep.mubr.bf16.mxu1 %v4059_v0  ;;  %3349 = vmatpush3.bf16.msra.mxu1 %v3798_v25 }
 0x1f3   :  { %1266 = vmatmul.mubr.bf16.gmra.mxu0 %v4629_v43  ;;  %3350 = vmatprep.subr.bf16.mxu1 %v3799_v27 }
 0x1f4   :  { %1275 = vmatprep.mubr.bf16.mxu0 %v4059_v0 }
 0x1f6   :  { %3351 = vmatpush3.bf16.msra.mxu1 %v3800_v29 }
 0x1f7   :  { %3352 = vmatprep.subr.bf16.mxu1 %v3801_v31 }
 0x1f9   :  { %1349 = vmatmul.mubr.bf16.gmra.mxu1 %v4533_v42 }
 0x1fa   :  { %1358 = vmatprep.mubr.bf16.mxu1 %v4059_v0  ;;  %3353 = vmatpush3.bf16.msra.mxu1 %v3802_v33 }
 0x1fb   :  { %1276 = vmatmul.mubr.bf16.gmra.mxu0 %v4653_v55  ;;  %3354 = vmatprep.subr.bf16.mxu1 %v3803_v34 }
 0x1fc   :  { %1285 = vmatprep.mubr.bf16.mxu0 %v4059_v0 }
 0x1fe   :  { %3355 = vmatpush3.bf16.msra.mxu1 %v3804_v35 }
 0x1ff   :  { %3356 = vmatprep.subr.bf16.mxu1 %v3805_v37 }
 0x201   :  { %1359 = vmatmul.mubr.bf16.gmra.mxu1 %v4567_v62 }
 0x202   :  { %1368 = vmatprep.mubr.bf16.mxu1 %v4059_v0  ;;  %3357 = vmatpush3.bf16.msra.mxu1 %v3806_v39 }
 0x203   :  { %1286 = vmatmul.mubr.bf16.gmra.mxu0 %v4677_v8  ;;  %3358 = vmatprep.subr.bf16.mxu1 %v3807_v41 }
 0x204   :  { %1295 = vmatprep.mubr.bf16.mxu0 %v4059_v0 }
 0x206   :  { %3359 = vmatpush3.bf16.msra.mxu1 %v3808_v44 }
 0x207   :  { %3360 = vmatprep.subr.bf16.mxu1 %v3809_v46  ;;  %v3830_v46 = vld [vmem:[#allocation4 + $0x138] sm:$0xff]  }
 0x209   :  { %1369 = vmatmul.mubr.bf16.gmra.mxu1 %v4601_v20 }
 0x20a   :  { %1378 = vmatprep.mubr.bf16.mxu1 %v4059_v0  ;;  %3361 = vmatpush3.bf16.msra.mxu1 %v3810_v47 }
 0x20b   :  { %1296 = vmatmul.mubr.bf16.gmra.mxu0 %v4701_v22  ;;  %3362 = vmatprep.subr.bf16.mxu1 %v3811_v48  ;;  %v3831_v48 = vld [vmem:[#allocation4 + $0x170] sm:$0xff]  }
 0x20c   :  { %1451 = vmatprep.mubr.bf16.mxu0 %v4059_v0 }
 0x20e   :  { %3363 = vmatpush3.bf16.msra.mxu1 %v3812_v49 }
 0x20f   :  { %3476 = vmatprep.subr.bf16.mxu1 %v3829_v1 }
 0x211   :  { %1379 = vmatmul.mubr.bf16.gmra.mxu1 %v4629_v43 }
 0x212   :  { %1388 = vmatprep.mubr.bf16.mxu1 %v4059_v0 }
 0x213   :  { %1452 = vmatmul.mubr.bf16.vlgmr.msra.gmra.mxu0 %v4504_v28  ;;  %v3820_v28 = vld [vmem:[#allocation4 + $0xa0] sm:$0xff]  }
 0x214   :  { %1461 = vmatprep.mubr.bf16.mxu0 %v4059_v0  ;;  %3413 = vmatpush3.bf16.msra.mxu0 %v3814_v52 }
 0x215   :  { %3414 = vmatprep.subr.bf16.mxu0 %v3815_v53 }
 0x218   :  { %3415 = vmatpush3.bf16.msra.mxu0 %v3816_v54 }
 0x219   :  { %3416 = vmatprep.subr.bf16.mxu0 %v3817_v56  ;;  %1389 = vmatmul.mubr.bf16.gmra.mxu1 %v4653_v55 }
 0x21a   :  { %1398 = vmatprep.mubr.bf16.mxu1 %v4059_v0 }
 0x21b   :  { %1462 = vmatmul.mubr.bf16.gmra.mxu0 %v4533_v42  ;;  %v3824_v42 = vld [vmem:[#allocation4 + $0x90] sm:$0xff]  }
 0x21c   :  { %1471 = vmatprep.mubr.bf16.mxu0 %v4059_v0  ;;  %3417 = vmatpush3.bf16.msra.mxu0 %v3818_v58 }
 0x21d   :  { %3418 = vmatprep.subr.bf16.mxu0 %v3819_v61  ;;  %v3832_v61 = vld [vmem:[#allocation4 + $0x130] sm:$0xff]  }
 0x220   :  { %3419 = vmatpush3.bf16.msra.mxu0 %v3820_v28 }
 0x221   :  { %3420 = vmatprep.subr.bf16.mxu0 %v3821_v63  ;;  %1399 = vmatmul.mubr.bf16.gmra.mxu1 %v4677_v8  ;;  %v3833_v63 = vld [vmem:[#allocation4 + $0x168] sm:$0xff]  }
 0x222   :  { %1408 = vmatprep.mubr.bf16.mxu1 %v4059_v0 }
 0x223   :  { %1472 = vmatmul.mubr.bf16.gmra.mxu0 %v4567_v62  ;;  %v3828_v62 = vld [vmem:[#allocation4 + $0x80] sm:$0xff]  }
 0x224   :  { %1481 = vmatprep.mubr.bf16.mxu0 %v4059_v0  ;;  %3421 = vmatpush3.bf16.msra.mxu0 %v3822_v3 }
 0x225   :  { %3422 = vmatprep.subr.bf16.mxu0 %v3823_v4 }
 0x228   :  { %3423 = vmatpush3.bf16.msra.mxu0 %v3824_v42 }
 0x229   :  { %3424 = vmatprep.subr.bf16.mxu0 %v3825_v7  ;;  %1409 = vmatmul.mubr.bf16.gmra.mxu1 %v4701_v22 }
 0x22b   :  { %1482 = vmatmul.mubr.bf16.gmra.mxu0 %v4601_v20  ;;  %v4746_v20 = vshrl.u32 %v157_v5, 7 }
 0x22c   :  { %1491 = vmatprep.mubr.bf16.mxu0 %v4059_v0  ;;  %3425 = vmatpush3.bf16.msra.mxu0 %v3826_v9 }
 0x22d   :  { %3426 = vmatprep.subr.bf16.mxu0 %v3827_v11  ;;  %v722_v13 = vsub.s32 0, %v4746_v20  ;;  %v3834_v11 = vld [vmem:[#allocation4 + $0x128] sm:$0xff]  }
 0x230   :  { %3427 = vmatpush3.bf16.msra.mxu0 %v3828_v62 }
 0x231   :  { %3540 = vmatprep.subr.bf16.mxu0 %v3845_v12  ;;  %v3835_v12 = vld [vmem:[#allocation4 + $0x160] sm:$0xff]  }
 0x233   :  { %1492 = vmatmul.mubr.bf16.gmra.mxu0 %v4629_v43  ;;  %v4752_v43 = vld [vmem:[%s5162_s8] sm:$0xff] }
 0x234   :  { %1501 = vmatprep.mubr.bf16.mxu0 %v4059_v0  ;;  %v4756_v14 = vrot.slane %v4752_v43, %v722_v13 }
 0x23b   :  { %1502 = vmatmul.mubr.bf16.gmra.mxu0 %v4653_v55  ;;  %v726_v55 = vsub.s32 1, %v4746_v20 }
 0x23c   :  { %1511 = vmatprep.mubr.bf16.mxu0 %v4059_v0 }
 0x243   :  { %1512 = vmatmul.mubr.bf16.gmra.mxu0 %v4677_v8 }
 0x244   :  { %1521 = vmatprep.mubr.bf16.mxu0 %v4059_v0  ;;  %v4761_v0 = vrot.slane %v4752_v43, %v726_v55 }
 0x24b   :  { %1522 = vmatmul.mubr.bf16.gmra.mxu0 %v4701_v22 }
 0x26f   :  { %v1114_v16 = vpop.f32.mrf.mxu1 }
 0x270   :  { %v1115_v18 = vadd.f32 %v1114_v16, %v4756_v14 }
 0x271   :  { %v1116_v21 = vpop.f32.mrf.mxu1 }
 0x272   :  { %v1117_v22 = vadd.f32 %v1116_v21, %v4761_v0  ;;  %v1532_v25 = vmax.f32 %v1115_v18, 0.0 }
 0x273   :  { %v4758_v8 = vpop.f32.mrf.mxu0  ;;  %v1118_v23 = vpop.f32.mrf.mxu1 }
 0x274   :  { %v1119_v24 = vadd.f32 %v1118_v23, %v4756_v14  ;;  %v1533_v29 = vmax.f32 %v1117_v22, 0.0  ;;  %v3836_v22 = vld [vmem:[#allocation4 + $0x120] sm:$0xff]  }
 0x275   :  { %v3698_v5 = vpop.f32.mrf.mxu0  ;;  %v1120_v27 = vpop.f32.mrf.mxu1 }
 0x276   :  { %v1540_v31 = vmax.f32 %v1119_v24, 0.0  ;;  %v1121_v33 = vadd.f32 %v1120_v27, %v4761_v0  ;;  %v3837_v24 = vld [vmem:[#allocation4 + $0x158] sm:$0xff]  }
 0x278   :  { %v1541_v35 = vmax.f32 %v1121_v33, 0.0  ;;  %v1660_v37 = vpack.c.bf16 %v1540_v31, %v1532_v25  ;;  %v3838_v33 = vld [vmem:[#allocation4 + $0x118] sm:$0xff]  }
 0x279   :  { %v1124_v34 = vpop.f32.mrf.mxu1 }
 0x27a   :  { %v1125_v38 = vadd.f32 %v1124_v34, %v4756_v14  ;;  %v1661_v44 = vpack.c.bf16 %v1541_v35, %v1533_v29  ;;  %v734_v35 = vsub.s32 3, %v4746_v20 }
 0x27b   :  { %v1126_v39 = vpop.f32.mrf.mxu1 }
 0x27c   :  { %v1127_v41 = vadd.f32 %v1126_v39, %v4761_v0  ;;  %2275 = vmatprep.mubr.bf16.mxu1 %v1661_v44  ;;  %v1548_v52 = vmax.f32 %v1125_v38, 0.0 }
 0x27d   :  { %v1128_v47 = vpop.f32.mrf.mxu1  ;;  %2276 = vmatmul.mubr.bf16.vlgmr.msra.gmra.mxu1 %v1660_v37  ;;  %v3839_v37 = vld [vmem:[#allocation4 + $0x150] sm:$0xff]  }
 0x27e   :  { %v1129_v49 = vadd.f32 %v1128_v47, %v4756_v14  ;;  %v1549_v54 = vmax.f32 %v1127_v41, 0.0  ;;  %3477 = vmatpush3.bf16.msra.mxu1 %v3830_v46  ;;  %v730_v41 = vsub.s32 2, %v4746_v20 }
 0x27f   :  { %v1130_v53 = vpop.f32.mrf.mxu1  ;;  %3478 = vmatprep.subr.bf16.mxu1 %v3831_v48 }
 0x280   :  { %v1556_v56 = vmax.f32 %v1129_v49, 0.0  ;;  %v1131_v58 = vadd.f32 %v1130_v53, %v4761_v0  ;;  %v3840_v49 = vld [vmem:[#allocation4 + $0x110] sm:$0xff]  }
 0x281   :  { %v1134_v28 = vpop.f32.mrf.mxu1 }
 0x282   :  { %v1557_v1 = vmax.f32 %v1131_v58, 0.0  ;;  %v1668_v3 = vpack.c.bf16 %v1556_v56, %v1548_v52  ;;  %v1135_v4 = vadd.f32 %v1134_v28, %v4756_v14  ;;  %3479 = vmatpush3.bf16.msra.mxu1 %v3832_v61  ;;  %v3841_v56 = vld [vmem:[#allocation4 + $0x148] sm:$0xff]   ;;  %v4785_v28 = vrot.slane %v4752_v43, %v730_v41 }
 0x283   :  { %v1136_v42 = vpop.f32.mrf.mxu1  ;;  %3480 = vmatprep.subr.bf16.mxu1 %v3833_v63 }
 0x284   :  { %v1137_v7 = vadd.f32 %v1136_v42, %v4761_v0  ;;  %v1669_v9 = vpack.c.bf16 %v1557_v1, %v1549_v54  ;;  %v1564_v55 = vmax.f32 %v1135_v4, 0.0  ;;  %v4782_v54 = vrot.slane %v4752_v43, %v734_v35 }
 0x285   :  { %v1138_v62 = vpop.f32.mrf.mxu1 }
 0x286   :  { %v1139_v13 = vadd.f32 %v1138_v62, %v4756_v14  ;;  %2283 = vmatprep.mubr.bf16.mxu1 %v1669_v9  ;;  %v1565_v5 = vmax.f32 %v1137_v7, 0.0  ;;  %3481 = vmatpush3.bf16.msra.mxu1 %v3834_v11  ;;  %v3842_v7 = vld [vmem:[#allocation4 + $0x108] sm:$0xff]  }
 0x287   :  { %v1140_v16 = vpop.f32.mrf.mxu1  ;;  %2284 = vmatmul.mubr.bf16.gmra.mxu1 %v1668_v3  ;;  %3482 = vmatprep.subr.bf16.mxu1 %v3835_v12 }
 0x288   :  { %v1572_v18 = vmax.f32 %v1139_v13, 0.0  ;;  %v1141_v21 = vadd.f32 %v1140_v16, %v4761_v0  ;;  %v3843_v13 = vld [vmem:[#allocation4 + $0x140] sm:$0xff]  }
 0x289   :  { %v1144_v23 = vpop.f32.mrf.mxu1 }
 0x28a   :  { %v1573_v25 = vmax.f32 %v1141_v21, 0.0  ;;  %v1676_v27 = vpack.c.bf16 %v1572_v18, %v1564_v55  ;;  %3483 = vmatpush3.bf16.msra.mxu1 %v3836_v22  ;;  %v1145_v44 = vadd.f32 %v1144_v23, %v4756_v14 }
 0x28b   :  { %v1146_v29 = vpop.f32.mrf.mxu1  ;;  %3484 = vmatprep.subr.bf16.mxu1 %v3837_v24 }
 0x28c   :  { %v1677_v31 = vpack.c.bf16 %v1573_v25, %v1565_v5  ;;  %v1147_v38 = vadd.f32 %v1146_v29, %v4761_v0  ;;  %v1580_v1 = vmax.f32 %v1145_v44, 0.0  ;;  %v3844_v29 = vld [vmem:[#allocation4 + $0x100] sm:$0xff]  }
 0x28d   :  { %v1148_v34 = vpop.f32.mrf.mxu1 }
 0x28e   :  { %v1149_v39 = vadd.f32 %v1148_v34, %v4756_v14  ;;  %2291 = vmatprep.mubr.bf16.mxu1 %v1677_v31  ;;  %3485 = vmatpush3.bf16.msra.mxu1 %v3838_v33  ;;  %v1581_v58 = vmax.f32 %v1147_v38, 0.0 }
 0x28f   :  { %v1150_v46 = vpop.f32.mrf.mxu1  ;;  %2292 = vmatmul.mubr.bf16.gmra.mxu1 %v1676_v27  ;;  %3486 = vmatprep.subr.bf16.mxu1 %v3839_v37 }
 0x290   :  { %v1151_v47 = vadd.f32 %v1150_v46, %v4761_v0  ;;  %v1588_v52 = vmax.f32 %v1149_v39, 0.0 }
 0x291   :  { %v1154_v53 = vpop.f32.mrf.mxu1 }
 0x292   :  { %v1589_v61 = vmax.f32 %v1151_v47, 0.0  ;;  %3487 = vmatpush3.bf16.msra.mxu1 %v3840_v49  ;;  %v1684_v9 = vpack.c.bf16 %v1588_v52, %v1580_v1  ;;  %v1155_v21 = vadd.f32 %v1154_v53, %v4756_v14 }
 0x293   :  { %v1227_v48 = vpop.f32.mrf.mxu0  ;;  %v1156_v3 = vpop.f32.mrf.mxu1  ;;  %3488 = vmatprep.subr.bf16.mxu1 %v3841_v56  ;;  %v3847_v56 = vld [vmem:[#allocation4 + $0x1f0] sm:$0xff]  }
 0x294   :  { %v1685_v42 = vpack.c.bf16 %v1589_v61, %v1581_v58  ;;  %v1228_v55 = vadd.f32 %v1227_v48, %v4785_v28  ;;  %v1157_v16 = vadd.f32 %v1156_v3, %v4761_v0  ;;  %v1596_v44 = vmax.f32 %v1155_v21, 0.0  ;;  %v3846_v48 = vld [vmem:[#allocation4 + $0x1b8] sm:$0xff]  }
 0x295   :  { %v1229_v63 = vpop.f32.mrf.mxu0  ;;  %v1158_v12 = vpop.f32.mrf.mxu1 }
 0x296   :  { %v1230_v11 = vadd.f32 %v1229_v63, %v4782_v54  ;;  %v1159_v5 = vadd.f32 %v1158_v12, %v4756_v14  ;;  %2299 = vmatprep.mubr.bf16.mxu1 %v1685_v42  ;;  %3489 = vmatpush3.bf16.msra.mxu1 %v3842_v7  ;;  %v1534_v37 = vmax.f32 %v1228_v55, 0.0  ;;  %v1597_v38 = vmax.f32 %v1157_v16, 0.0  ;;  %v3848_v12 = vld [vmem:[#allocation4 + $0x1b0] sm:$0xff]  }
 0x297   :  { %v1231_v4 = vpop.f32.mrf.mxu0  ;;  %v1160_v23 = vpop.f32.mrf.mxu1  ;;  %2300 = vmatmul.mubr.bf16.gmra.mxu1 %v1684_v9  ;;  %3490 = vmatprep.subr.bf16.mxu1 %v3843_v13 }
 0x298   :  { %v1232_v62 = vadd.f32 %v1231_v4, %v4785_v28  ;;  %v1161_v25 = vadd.f32 %v1160_v23, %v4761_v0  ;;  %v1535_v31 = vmax.f32 %v1230_v11, 0.0  ;;  %v1604_v33 = vmax.f32 %v1159_v5, 0.0  ;;  %v3849_v5 = vld [vmem:[#allocation4 + $0x1e8] sm:$0xff]  }
 0x299   :  { %v1233_v18 = vpop.f32.mrf.mxu0  ;;  %v1164_v35 = vpop.f32.mrf.mxu1 }
 0x29a   :  { %v1234_v22 = vadd.f32 %v1233_v18, %v4782_v54  ;;  %v1542_v24 = vmax.f32 %v1232_v62, 0.0  ;;  %v1605_v39 = vmax.f32 %v1161_v25, 0.0  ;;  %3491 = vmatpush3.bf16.msra.mxu1 %v3844_v29  ;;  %v1692_v58 = vpack.c.bf16 %v1604_v33, %v1596_v44 }
 0x29b   :  { %v1237_v27 = vpop.f32.mrf.mxu0  ;;  %v1166_v46 = vpop.f32.mrf.mxu1  ;;  %3699 = vmatprep.subr.mxu1 %v5172_v59  ;;  %v1165_v9 = vadd.f32 %v1164_v35, %v4756_v14  ;;  %v3850_v35 = vld [vmem:[#allocation4 + $0x1a8] sm:$0xff]  }
 0x29c   :  { %v1543_v34 = vmax.f32 %v1234_v22, 0.0  ;;  %v1662_v49 = vpack.c.bf16 %v1542_v24, %v1534_v37  ;;  %v1693_v52 = vpack.c.bf16 %v1605_v39, %v1597_v38  ;;  %v1238_v3 = vadd.f32 %v1237_v27, %v4785_v28 }
 0x29d   :  { %v1239_v41 = vpop.f32.mrf.mxu0  ;;  %v1168_v1 = vpop.f32.mrf.mxu1  ;;  %v1167_v4 = vadd.f32 %v1166_v46, %v4761_v0 }
 0x29e   :  { %v1663_v47 = vpack.c.bf16 %v1543_v34, %v1535_v31  ;;  %v1240_v61 = vadd.f32 %v1239_v41, %v4782_v54  ;;  %v1169_v42 = vadd.f32 %v1168_v1, %v4756_v14  ;;  %2307 = vmatprep.mubr.bf16.mxu1 %v1693_v52  ;;  %v1550_v24 = vmax.f32 %v1238_v3, 0.0  ;;  %v3851_v41 = vld [vmem:[#allocation4 + $0x1e0] sm:$0xff]  }
 0x29f   :  { %v1241_v53 = vpop.f32.mrf.mxu0  ;;  %v1170_v62 = vpop.f32.mrf.mxu1  ;;  %2308 = vmatmul.mubr.bf16.gmra.mxu1 %v1692_v58  ;;  %v1613_v25 = vmax.f32 %v1167_v4, 0.0  ;;  %v1612_v31 = vmax.f32 %v1165_v9, 0.0  ;;  %v3852_v1 = vld [vmem:[#allocation4 + $0x1a0] sm:$0xff]  }
 0x2a0   :  { %v1242_v63 = vadd.f32 %v1241_v53, %v4785_v28  ;;  %2372 = vmatprep.mubr.bf16.mxu0 %v1663_v47  ;;  %v1171_v55 = vadd.f32 %v1170_v62, %v4761_v0  ;;  %v1551_v18 = vmax.f32 %v1240_v61, 0.0  ;;  %v1620_v21 = vmax.f32 %v1169_v42, 0.0 }
 0x2a1   :  { %v1243_v7 = vpop.f32.mrf.mxu0  ;;  %2373 = vmatmul.mubr.bf16.vlgmr.msra.gmra.mxu0 %v1662_v49  ;;  %v1174_v23 = vpop.f32.mrf.mxu1 }
 0x2a2   :  { %v1244_v11 = vadd.f32 %v1243_v7, %v4782_v54  ;;  %3541 = vmatpush3.bf16.msra.mxu0 %v3846_v48  ;;  %v1558_v13 = vmax.f32 %v1242_v63, 0.0  ;;  %v1621_v27 = vmax.f32 %v1171_v55, 0.0  ;;  %v1700_v44 = vpack.c.bf16 %v1620_v21, %v1612_v31  ;;  %v3853_v7 = vld [vmem:[#allocation4 + $0x1d8] sm:$0xff]  }
 0x2a3   :  { %v1247_v16 = vpop.f32.mrf.mxu0  ;;  %3542 = vmatprep.subr.bf16.mxu0 %v3847_v56  ;;  %v1176_v33 = vpop.f32.mrf.mxu1  ;;  %v1175_v58 = vadd.f32 %v1174_v23, %v4756_v14  ;;  %v3854_v23 = vld [vmem:[#allocation4 + $0x198] sm:$0xff]  }
 0x2a4   :  { %v1559_v22 = vmax.f32 %v1244_v11, 0.0  ;;  %v1670_v37 = vpack.c.bf16 %v1558_v13, %v1550_v24  ;;  %v1701_v38 = vpack.c.bf16 %v1621_v27, %v1613_v25  ;;  %v1248_v49 = vadd.f32 %v1247_v16, %v4785_v28 }
 0x2a5   :  { %v1249_v29 = vpop.f32.mrf.mxu0  ;;  %v1178_v48 = vpop.f32.mrf.mxu1  ;;  %v1177_v52 = vadd.f32 %v1176_v33, %v4761_v0 }
 0x2a6   :  { %v1671_v34 = vpack.c.bf16 %v1559_v22, %v1551_v18  ;;  %3543 = vmatpush3.bf16.msra.mxu0 %v3848_v12  ;;  %v1250_v46 = vadd.f32 %v1249_v29, %v4782_v54  ;;  %v1179_v53 = vadd.f32 %v1178_v48, %v4756_v14  ;;  %2315 = vmatprep.mubr.bf16.mxu1 %v1701_v38  ;;  %v1566_v13 = vmax.f32 %v1248_v49, 0.0  ;;  %v3855_v29 = vld [vmem:[#allocation4 + $0x1d0] sm:$0xff]  }
 0x2a7   :  { %v1251_v39 = vpop.f32.mrf.mxu0  ;;  %3544 = vmatprep.subr.bf16.mxu0 %v3849_v5  ;;  %v1180_v63 = vpop.f32.mrf.mxu1  ;;  %2316 = vmatmul.mubr.bf16.gmra.mxu1 %v1700_v44  ;;  %v1629_v55 = vmax.f32 %v1177_v52, 0.0  ;;  %v1628_v18 = vmax.f32 %v1175_v58, 0.0  ;;  %v742_v44 = vsub.s32 5, %v4746_v20  ;;  %v738_v49 = vsub.s32 4, %v4746_v20  ;;  %v3856_v52 = vld [vmem:[#allocation4 + $0x190] sm:$0xff]  }
 0x2a8   :  { %v1252_v47 = vadd.f32 %v1251_v39, %v4785_v28  ;;  %2380 = vmatprep.mubr.bf16.mxu0 %v1671_v34  ;;  %v1181_v4 = vadd.f32 %v1180_v63, %v4761_v0  ;;  %v1567_v9 = vmax.f32 %v1250_v46, 0.0  ;;  %v1636_v11 = vmax.f32 %v1179_v53, 0.0 }
 0x2a9   :  { %v1253_v56 = vpop.f32.mrf.mxu0  ;;  %2381 = vmatmul.mubr.bf16.gmra.mxu0 %v1670_v37  ;;  %v1184_v12 = vpop.f32.mrf.mxu1 }
 0x2aa   :  { %v1254_v61 = vadd.f32 %v1253_v56, %v4782_v54  ;;  %3545 = vmatpush3.bf16.msra.mxu0 %v3850_v35  ;;  %v1574_v3 = vmax.f32 %v1252_v47, 0.0  ;;  %v1637_v16 = vmax.f32 %v1181_v4, 0.0  ;;  %v1708_v31 = vpack.c.bf16 %v1636_v11, %v1628_v18 }
 0x2ab   :  { %v1257_v42 = vpop.f32.mrf.mxu0  ;;  %3546 = vmatprep.subr.bf16.mxu0 %v3851_v41  ;;  %v1186_v21 = vpop.f32.mrf.mxu1  ;;  %v1185_v46 = vadd.f32 %v1184_v12, %v4756_v14  ;;  %v4823_v11 = vrot.slane %v4752_v43, %v742_v44  ;;  %v4826_v12 = vrot.slane %v4752_v43, %v738_v49 }
 0x2ac   :  { %v1575_v62 = vmax.f32 %v1254_v61, 0.0  ;;  %v1678_v24 = vpack.c.bf16 %v1574_v3, %v1566_v13  ;;  %v1709_v25 = vpack.c.bf16 %v1637_v16, %v1629_v55  ;;  %v1258_v37 = vadd.f32 %v1257_v42, %v4785_v28  ;;  %v3857_v61 = vld [vmem:[#allocation4 + $0x1c8] sm:$0xff]  }
 0x2ad   :  { %v1259_v5 = vpop.f32.mrf.mxu0  ;;  %v1188_v35 = vpop.f32.mrf.mxu1  ;;  %v1187_v38 = vadd.f32 %v1186_v21, %v4761_v0  ;;  %v3858_v55 = vld [vmem:[#allocation4 + $0x188] sm:$0xff]   ;;  %v3859_v21 = vld [vmem:[#allocation4 + $0x1c0] sm:$0xff]  }
 0x2ae   :  { %v1679_v22 = vpack.c.bf16 %v1575_v62, %v1567_v9  ;;  %3547 = vmatpush3.bf16.msra.mxu0 %v3852_v1  ;;  %v1260_v33 = vadd.f32 %v1259_v5, %v4782_v54  ;;  %v1189_v39 = vadd.f32 %v1188_v35, %v4756_v14  ;;  %2323 = vmatprep.mubr.bf16.mxu1 %v1709_v25  ;;  %v1582_v42 = vmax.f32 %v1258_v37, 0.0 }
 0x2af   :  { %v1261_v27 = vpop.f32.mrf.mxu0  ;;  %3548 = vmatprep.subr.bf16.mxu0 %v3853_v7  ;;  %v1190_v48 = vpop.f32.mrf.mxu1  ;;  %2324 = vmatmul.mubr.bf16.gmra.mxu1 %v1708_v31  ;;  %v1645_v14 = vmax.f32 %v1187_v38, 0.0  ;;  %v1644_v62 = vmax.f32 %v1185_v46, 0.0  ;;  %v3860_v38 = vld [vmem:[#allocation4 + $0x180] sm:$0xff]  }
 0x2b0   :  { %v1262_v34 = vadd.f32 %v1261_v27, %v4785_v28  ;;  %2388 = vmatprep.mubr.bf16.mxu0 %v1679_v22  ;;  %v1191_v56 = vadd.f32 %v1190_v48, %v4761_v0  ;;  %v1583_v63 = vmax.f32 %v1260_v33, 0.0  ;;  %v1652_v1 = vmax.f32 %v1189_v39, 0.0 }
 0x2b1   :  { %v1263_v41 = vpop.f32.mrf.mxu0  ;;  %2389 = vmatmul.mubr.bf16.gmra.mxu0 %v1678_v24  ;;  %v1340_v4 = vpop.f32.mrf.mxu1 }
 0x2b2   :  { %v1264_v47 = vadd.f32 %v1263_v41, %v4782_v54  ;;  %3549 = vmatpush3.bf16.msra.mxu0 %v3854_v23  ;;  %v1590_v53 = vmax.f32 %v1262_v34, 0.0  ;;  %v1653_v7 = vmax.f32 %v1191_v56, 0.0  ;;  %v1716_v22 = vpack.c.bf16 %v1652_v1, %v1644_v62 }
 0x2b3   :  { %v1267_v58 = vpop.f32.mrf.mxu0  ;;  %3550 = vmatprep.subr.bf16.mxu0 %v3855_v29  ;;  %v1342_v13 = vpop.f32.mrf.mxu1  ;;  %v1341_v34 = vadd.f32 %v1340_v4, %v4826_v12 }
 0x2b4   :  { %v1591_v3 = vmax.f32 %v1264_v47, 0.0  ;;  %v1686_v16 = vpack.c.bf16 %v1590_v53, %v1582_v42  ;;  %v1717_v5 = vpack.c.bf16 %v1653_v7, %v1645_v14  ;;  %v1268_v27 = vadd.f32 %v1267_v58, %v4785_v28 }
 0x2b5   :  { %v1269_v9 = vpop.f32.mrf.mxu0  ;;  %v1344_v25 = vpop.f32.mrf.mxu1  ;;  %v1343_v29 = vadd.f32 %v1342_v13, %v4823_v11 }
 0x2b6   :  { %v1687_v0 = vpack.c.bf16 %v1591_v3, %v1583_v63  ;;  %3551 = vmatpush3.bf16.msra.mxu0 %v3856_v52  ;;  %v1270_v23 = vadd.f32 %v1269_v9, %v4782_v54  ;;  %v1345_v31 = vadd.f32 %v1344_v25, %v4826_v12  ;;  %2331 = vmatprep.mubr.bf16.mxu1 %v1717_v5  ;;  %v1598_v52 = vmax.f32 %v1268_v27, 0.0 }
 0x2b7   :  { %v1271_v18 = vpop.f32.mrf.mxu0  ;;  %3552 = vmatprep.subr.bf16.mxu0 %v3857_v61  ;;  %v1346_v37 = vpop.f32.mrf.mxu1  ;;  %2332 = vmatmul.mubr.bf16.gmra.mxu1 %v1716_v22  ;;  %v1537_v53 = vmax.f32 %v1343_v29, 0.0  ;;  %v1536_v61 = vmax.f32 %v1341_v34, 0.0 }
 0x2b8   :  { %v1272_v24 = vadd.f32 %v1271_v18, %v4785_v28  ;;  %2396 = vmatprep.mubr.bf16.mxu0 %v1687_v0  ;;  %v1347_v41 = vadd.f32 %v1346_v37, %v4823_v11  ;;  %v1599_v46 = vmax.f32 %v1270_v23, 0.0  ;;  %v1544_v47 = vmax.f32 %v1345_v31, 0.0 }
 0x2b9   :  { %v1273_v33 = vpop.f32.mrf.mxu0  ;;  %2397 = vmatmul.mubr.bf16.gmra.mxu0 %v1686_v16  ;;  %v1350_v49 = vpop.f32.mrf.mxu1 }
 0x2ba   :  { %v1274_v35 = vadd.f32 %v1273_v33, %v4782_v54  ;;  %3553 = vmatpush3.bf16.msra.mxu0 %v3858_v55  ;;  %v1606_v39 = vmax.f32 %v1272_v24, 0.0  ;;  %v1545_v56 = vmax.f32 %v1347_v41, 0.0  ;;  %v1664_v14 = vpack.c.bf16 %v1544_v47, %v1536_v61 }
 0x2bb   :  { %v1277_v44 = vpop.f32.mrf.mxu0  ;;  %3554 = vmatprep.subr.bf16.mxu0 %v3859_v21  ;;  %v1352_v63 = vpop.f32.mrf.mxu1  ;;  %v1351_v5 = vadd.f32 %v1350_v49, %v4826_v12 }
 0x2bc   :  { %v1607_v48 = vmax.f32 %v1274_v35, 0.0  ;;  %v1694_v3 = vpack.c.bf16 %v1606_v39, %v1598_v52  ;;  %v1665_v4 = vpack.c.bf16 %v1545_v56, %v1537_v53  ;;  %v1278_v13 = vadd.f32 %v1277_v44, %v4785_v28 }
 0x2bd   :  { %v1279_v58 = vpop.f32.mrf.mxu0  ;;  %v1354_v62 = vpop.f32.mrf.mxu1  ;;  %v1353_v0 = vadd.f32 %v1352_v63, %v4823_v11 }
 0x2be   :  { %v1695_v1 = vpack.c.bf16 %v1607_v48, %v1599_v46  ;;  %3555 = vmatpush3.bf16.msra.mxu0 %v3860_v38  ;;  %v1280_v7 = vadd.f32 %v1279_v58, %v4782_v54  ;;  %v1355_v55 = vadd.f32 %v1354_v62, %v4826_v12  ;;  %2469 = vmatprep.mubr.bf16.mxu1 %v1665_v4  ;;  %v1614_v33 = vmax.f32 %v1278_v13, 0.0 }
 0x2bf   :  { %v1281_v42 = vpop.f32.mrf.mxu0  ;;  %3734 = vmatprep.subr.bf16.mxu0 %v5172_v59  ;;  %v1356_v21 = vpop.f32.mrf.mxu1  ;;  %2470 = vmatmul.mubr.bf16.vlgmr.msra.gmra.mxu1 %v1664_v14  ;;  %v1553_v34 = vmax.f32 %v1353_v0, 0.0  ;;  %v1552_v38 = vmax.f32 %v1351_v5, 0.0 }
 0x2c0   :  { %v1282_v9 = vadd.f32 %v1281_v42, %v4785_v28  ;;  %2404 = vmatprep.mubr.bf16.mxu0 %v1695_v1  ;;  %v1357_v23 = vadd.f32 %v1356_v21, %v4823_v11  ;;  %v1615_v25 = vmax.f32 %v1280_v7, 0.0  ;;  %v1560_v27 = vmax.f32 %v1355_v55, 0.0 }
 0x2c1   :  { %v1283_v16 = vpop.f32.mrf.mxu0  ;;  %2405 = vmatmul.mubr.bf16.gmra.mxu0 %v1694_v3  ;;  %v1360_v31 = vpop.f32.mrf.mxu1 }
 0x2c2   :  { %v1284_v18 = vadd.f32 %v1283_v16, %v4782_v54  ;;  %v1622_v22 = vmax.f32 %v1282_v9, 0.0  ;;  %v1561_v35 = vmax.f32 %v1357_v23, 0.0  ;;  %v1672_v48 = vpack.c.bf16 %v1560_v27, %v1552_v38 }
 0x2c3   :  { %v1287_v24 = vpop.f32.mrf.mxu0  ;;  %v1362_v41 = vpop.f32.mrf.mxu1  ;;  %v1361_v1 = vadd.f32 %v1360_v31, %v4826_v12 }
 0x2c4   :  { %v1623_v29 = vmax.f32 %v1284_v18, 0.0  ;;  %v1702_v44 = vpack.c.bf16 %v1622_v22, %v1614_v33  ;;  %v1673_v46 = vpack.c.bf16 %v1561_v35, %v1553_v34  ;;  %v1288_v56 = vadd.f32 %v1287_v24, %v4785_v28 }
 0x2c5   :  { %v1289_v37 = vpop.f32.mrf.mxu0  ;;  %v1364_v53 = vpop.f32.mrf.mxu1  ;;  %v1363_v58 = vadd.f32 %v1362_v41, %v4823_v11  ;;  %v1568_v21 = vmax.f32 %v1361_v1, 0.0  ;;  %v750_v35 = vsub.s32 7, %v4746_v20 }
 0x2c6   :  { %v1703_v39 = vpack.c.bf16 %v1623_v29, %v1615_v25  ;;  %v1290_v49 = vadd.f32 %v1289_v37, %v4782_v54  ;;  %v1365_v61 = vadd.f32 %v1364_v53, %v4826_v12  ;;  %2477 = vmatprep.mubr.bf16.mxu1 %v1673_v46  ;;  %v1630_v55 = vmax.f32 %v1288_v56, 0.0 }
 0x2c7   :  { %v1291_v47 = vpop.f32.mrf.mxu0  ;;  %v1366_v4 = vpop.f32.mrf.mxu1  ;;  %2478 = vmatmul.mubr.bf16.gmra.mxu1 %v1672_v48  ;;  %v1569_v16 = vmax.f32 %v1363_v58, 0.0 }
 0x2c8   :  { %v1292_v52 = vadd.f32 %v1291_v47, %v4785_v28  ;;  %2412 = vmatprep.mubr.bf16.mxu0 %v1703_v39  ;;  %v1367_v14 = vadd.f32 %v1366_v4, %v4823_v11  ;;  %v1631_v9 = vmax.f32 %v1290_v49, 0.0  ;;  %v1576_v62 = vmax.f32 %v1365_v61, 0.0 }
 0x2c9   :  { %v1293_v63 = vpop.f32.mrf.mxu0  ;;  %2413 = vmatmul.mubr.bf16.gmra.mxu0 %v1702_v44  ;;  %v1370_v0 = vpop.f32.mrf.mxu1  ;;  %v746_v44 = vsub.s32 6, %v4746_v20 }
 0x2ca   :  { %v1294_v3 = vadd.f32 %v1293_v63, %v4782_v54  ;;  %v1638_v42 = vmax.f32 %v1292_v52, 0.0  ;;  %v1577_v5 = vmax.f32 %v1367_v14, 0.0  ;;  %v1680_v29 = vpack.c.bf16 %v1576_v62, %v1568_v21 }
 0x2cb   :  { %v1297_v7 = vpop.f32.mrf.mxu0  ;;  %v1372_v23 = vpop.f32.mrf.mxu1  ;;  %v1371_v46 = vadd.f32 %v1370_v0, %v4826_v12  ;;  %v4864_v63 = vrot.slane %v4752_v43, %v750_v35  ;;  %v4867_v4 = vrot.slane %v4752_v43, %v746_v44 }
 0x2cc   :  { %v1639_v13 = vmax.f32 %v1294_v3, 0.0  ;;  %v1710_v24 = vpack.c.bf16 %v1638_v42, %v1630_v55  ;;  %v1681_v25 = vpack.c.bf16 %v1577_v5, %v1569_v16  ;;  %v1298_v37 = vadd.f32 %v1297_v7, %v4785_v28 }
 0x2cd   :  { %v1299_v18 = vpop.f32.mrf.mxu0  ;;  %v1374_v34 = vpop.f32.mrf.mxu1  ;;  %v1373_v38 = vadd.f32 %v1372_v23, %v4823_v11  ;;  %v1584_v42 = vmax.f32 %v1371_v46, 0.0 }
 0x2ce   :  { %v1711_v22 = vpack.c.bf16 %v1639_v13, %v1631_v9  ;;  %v1300_v31 = vadd.f32 %v1299_v18, %v4782_v54  ;;  %v1375_v39 = vadd.f32 %v1374_v34, %v4826_v12  ;;  %2485 = vmatprep.mubr.bf16.mxu1 %v1681_v25  ;;  %v1646_v1 = vmax.f32 %v1298_v37, 0.0 }
 0x2cf   :  { %v1301_v27 = vpop.f32.mrf.mxu0  ;;  %v1376_v48 = vpop.f32.mrf.mxu1  ;;  %2486 = vmatmul.mubr.bf16.gmra.mxu1 %v1680_v29  ;;  %v1585_v3 = vmax.f32 %v1373_v38, 0.0 }
 0x2d0   :  { %v1302_v33 = vadd.f32 %v1301_v27, %v4785_v28  ;;  %2420 = vmatprep.mubr.bf16.mxu0 %v1711_v22  ;;  %v1377_v52 = vadd.f32 %v1376_v48, %v4823_v11  ;;  %v1647_v28 = vmax.f32 %v1300_v31, 0.0  ;;  %v1592_v56 = vmax.f32 %v1375_v39, 0.0 }
 0x2d1   :  { %v1303_v41 = vpop.f32.mrf.mxu0  ;;  %2421 = vmatmul.mubr.bf16.gmra.mxu0 %v1710_v24  ;;  %v1380_v61 = vpop.f32.mrf.mxu1 }
 0x2d2   :  { %v1304_v47 = vadd.f32 %v1303_v41, %v4782_v54  ;;  %v1654_v49 = vmax.f32 %v1302_v33, 0.0  ;;  %v1593_v20 = vmax.f32 %v1377_v52, 0.0  ;;  %v1688_v0 = vpack.c.bf16 %v1592_v56, %v1584_v42 }
 0x2d3   :  { %v1453_v53 = vpop.f32.mrf.mxu0  ;;  %v1382_v7 = vpop.f32.mrf.mxu1  ;;  %v1381_v23 = vadd.f32 %v1380_v61, %v4826_v12 }
 0x2d4   :  { %v1655_v58 = vmax.f32 %v1304_v47, 0.0  ;;  %v1718_v9 = vpack.c.bf16 %v1654_v49, %v1646_v1  ;;  %v1689_v62 = vpack.c.bf16 %v1593_v20, %v1585_v3  ;;  %v1454_v18 = vadd.f32 %v1453_v53, %v4867_v4  ;;  %v3861_v49 = vld [vmem:[#allocation9 + $0x38] sm:$0xff]  }
 0x2d5   :  { %v1455_v54 = vpop.f32.mrf.mxu0  ;;  %v1384_v5 = vpop.f32.mrf.mxu1  ;;  %v1383_v21 = vadd.f32 %v1382_v7, %v4823_v11  ;;  %v1600_v46 = vmax.f32 %v1381_v23, 0.0 }
 0x2d6   :  { %v1719_v14 = vpack.c.bf16 %v1655_v58, %v1647_v28  ;;  %v1456_v55 = vadd.f32 %v1455_v54, %v4864_v63  ;;  %v1385_v43 = vadd.f32 %v1384_v5, %v4826_v12  ;;  %2493 = vmatprep.mubr.bf16.mxu1 %v1689_v62  ;;  %v1538_v38 = vmax.f32 %v1454_v18, 0.0  ;;  %v3862_v62 = vld [vmem:[#allocation9 + $0x30] sm:$0xff]  }
 0x2d7   :  { %v1457_v13 = vpop.f32.mrf.mxu0  ;;  %v1386_v25 = vpop.f32.mrf.mxu1  ;;  %2494 = vmatmul.mubr.bf16.gmra.mxu1 %v1688_v0  ;;  %v1601_v39 = vmax.f32 %v1383_v21, 0.0 }
 0x2d8   :  { %v1458_v16 = vadd.f32 %v1457_v13, %v4867_v4  ;;  %2428 = vmatprep.mubr.bf16.mxu0 %v1719_v14  ;;  %v1387_v29 = vadd.f32 %v1386_v25, %v4823_v11  ;;  %v1539_v33 = vmax.f32 %v1456_v55, 0.0  ;;  %v1608_v34 = vmax.f32 %v1385_v43, 0.0 }
 0x2d9   :  { %v1459_v22 = vpop.f32.mrf.mxu0  ;;  %2429 = vmatmul.mubr.bf16.gmra.mxu0 %v1718_v9  ;;  %v1390_v37 = vpop.f32.mrf.mxu1 }
 0x2da   :  { %v1460_v24 = vadd.f32 %v1459_v22, %v4864_v63  ;;  %v1546_v27 = vmax.f32 %v1458_v16, 0.0  ;;  %v1609_v41 = vmax.f32 %v1387_v29, 0.0  ;;  %v1696_v56 = vpack.c.bf16 %v1608_v34, %v1600_v46 }
 0x2db   :  { %v1463_v31 = vpop.f32.mrf.mxu0  ;;  %v1392_v48 = vpop.f32.mrf.mxu1  ;;  %v1391_v14 = vadd.f32 %v1390_v37, %v4826_v12 }
 0x2dc   :  { %v1547_v35 = vmax.f32 %v1460_v24, 0.0  ;;  %v1666_v52 = vpack.c.bf16 %v1546_v27, %v1538_v38  ;;  %v1697_v53 = vpack.c.bf16 %v1609_v41, %v1601_v39  ;;  %v1464_v3 = vadd.f32 %v1463_v31, %v4867_v4  ;;  %v3863_v31 = vld [vmem:[#allocation9 + $0x28] sm:$0xff]  }
 0x2dd   :  { %v1465_v44 = vpop.f32.mrf.mxu0  ;;  %v1394_v1 = vpop.f32.mrf.mxu1  ;;  %v1393_v20 = vadd.f32 %v1392_v48, %v4823_v11  ;;  %v1616_v25 = vmax.f32 %v1391_v14, 0.0 }
 0x2de   :  { %v1667_v47 = vpack.c.bf16 %v1547_v35, %v1539_v33  ;;  %v1466_v58 = vadd.f32 %v1465_v44, %v4864_v63  ;;  %v1395_v54 = vadd.f32 %v1394_v1, %v4826_v12  ;;  %2501 = vmatprep.mubr.bf16.mxu1 %v1697_v53  ;;  %v1554_v43 = vmax.f32 %v1464_v3, 0.0 }
 0x2df   :  { %v1467_v28 = vpop.f32.mrf.mxu0  ;;  %v1396_v9 = vpop.f32.mrf.mxu1  ;;  %2502 = vmatmul.mubr.bf16.gmra.mxu1 %v1696_v56  ;;  %v1617_v22 = vmax.f32 %v1393_v20, 0.0 }
 0x2e0   :  { %v1468_v61 = vadd.f32 %v1467_v28, %v4867_v4  ;;  %2566 = vmatprep.mubr.bf16.mxu0 %v1667_v47  ;;  %v1397_v0 = vadd.f32 %v1396_v9, %v4823_v11  ;;  %v1555_v16 = vmax.f32 %v1466_v58, 0.0  ;;  %v1624_v5 = vmax.f32 %v1395_v54, 0.0  ;;  %v3864_v28 = vld [vmem:[#allocation9 + $0x20] sm:$0xff]  }
 0x2e1   :  { %v1469_v42 = vpop.f32.mrf.mxu0  ;;  %2567 = vmatmul.mubr.bf16.vlgmr.msra.gmra.mxu0 %v1666_v52  ;;  %v1400_v21 = vpop.f32.mrf.mxu1 }
 0x2e2   :  { %v1470_v7 = vadd.f32 %v1469_v42, %v4864_v63  ;;  %3735 = vmatpush3.bf16.msra.mxu0 %v3861_v49  ;;  %v1562_v13 = vmax.f32 %v1468_v61, 0.0  ;;  %v1625_v23 = vmax.f32 %v1397_v0, 0.0  ;;  %v1704_v37 = vpack.c.bf16 %v1624_v5, %v1616_v25 }
 0x2e3   :  { %v1473_v55 = vpop.f32.mrf.mxu0  ;;  %3736 = vmatprep.subr.bf16.mxu0 %v5172_v59  ;;  %v1402_v29 = vpop.f32.mrf.mxu1  ;;  %v1401_v49 = vadd.f32 %v1400_v21, %v4826_v12 }
 0x2e4   :  { %v1563_v18 = vmax.f32 %v1470_v7, 0.0  ;;  %v1674_v33 = vpack.c.bf16 %v1562_v13, %v1554_v43  ;;  %v1705_v34 = vpack.c.bf16 %v1625_v23, %v1617_v22  ;;  %v1474_v44 = vadd.f32 %v1473_v55, %v4867_v4  ;;  %v3865_v55 = vld [vmem:[#allocation9 + $0x18] sm:$0xff]  }
 0x2e5   :  { %v1475_v24 = vpop.f32.mrf.mxu0  ;;  %v1404_v41 = vpop.f32.mrf.mxu1  ;;  %v1403_v46 = vadd.f32 %v1402_v29, %v4823_v11 }
 0x2e6   :  { %v1675_v27 = vpack.c.bf16 %v1563_v18, %v1555_v16  ;;  %3737 = vmatpush3.bf16.msra.mxu0 %v3862_v62  ;;  %v1476_v38 = vadd.f32 %v1475_v24, %v4864_v63  ;;  %v1405_v47 = vadd.f32 %v1404_v41, %v4826_v12  ;;  %2509 = vmatprep.mubr.bf16.mxu1 %v1705_v34  ;;  %v1570_v42 = vmax.f32 %v1474_v44, 0.0 }
 0x2e7   :  { %v1477_v35 = vpop.f32.mrf.mxu0  ;;  %3738 = vmatprep.subr.bf16.mxu0 %v5172_v59  ;;  %v1406_v53 = vpop.f32.mrf.mxu1  ;;  %2510 = vmatmul.mubr.bf16.gmra.mxu1 %v1704_v37  ;;  %v1633_v14 = vmax.f32 %v1403_v46, 0.0  ;;  %v1632_v62 = vmax.f32 %v1401_v49, 0.0 }
 0x2e8   :  { %v1478_v39 = vadd.f32 %v1477_v35, %v4867_v4  ;;  %2574 = vmatprep.mubr.bf16.mxu0 %v1675_v27  ;;  %v1407_v58 = vadd.f32 %v1406_v53, %v4823_v11  ;;  %v1571_v1 = vmax.f32 %v1476_v38, 0.0  ;;  %v1640_v3 = vmax.f32 %v1405_v47, 0.0  ;;  %v3866_v35 = vld [vmem:[#allocation9 + $0x10] sm:$0xff]  }
 0x2e9   :  { %v1479_v48 = vpop.f32.mrf.mxu0  ;;  %2575 = vmatmul.mubr.bf16.gmra.mxu0 %v1674_v33  ;;  %v1410_v54 = vpop.f32.mrf.mxu1 }
 0x2ea   :  { %v1480_v52 = vadd.f32 %v1479_v48, %v4864_v63  ;;  %3739 = vmatpush3.bf16.msra.mxu0 %v3863_v31  ;;  %v1578_v56 = vmax.f32 %v1478_v39, 0.0  ;;  %v1641_v7 = vmax.f32 %v1407_v58, 0.0  ;;  %v1712_v21 = vpack.c.bf16 %v1640_v3, %v1632_v62 }
 0x2eb   :  { %v1483_v61 = vpop.f32.mrf.mxu0  ;;  %3740 = vmatprep.subr.bf16.mxu0 %v5172_v59  ;;  %v1412_v0 = vpop.f32.mrf.mxu1  ;;  %v1411_v31 = vadd.f32 %v1410_v54, %v4826_v12 }
 0x2ec   :  { %v1579_v20 = vmax.f32 %v1480_v52, 0.0  ;;  %v1682_v16 = vpack.c.bf16 %v1578_v56, %v1570_v42  ;;  %v1713_v5 = vpack.c.bf16 %v1641_v7, %v1633_v14  ;;  %v1484_v24 = vadd.f32 %v1483_v61, %v4867_v4  ;;  %v3868_v14 = vld [vmem:[#allocation9] sm:$0xff]  }
 0x2ed   :  { %v1485_v9 = vpop.f32.mrf.mxu0  ;;  %v1414_v23 = vpop.f32.mrf.mxu1  ;;  %v1413_v25 = vadd.f32 %v1412_v0, %v4823_v11 }
 0x2ee   :  { %v1683_v13 = vpack.c.bf16 %v1579_v20, %v1571_v1  ;;  %3741 = vmatpush3.bf16.msra.mxu0 %v3864_v28  ;;  %v1486_v43 = vadd.f32 %v1485_v9, %v4864_v63  ;;  %v1415_v27 = vadd.f32 %v1414_v23, %v4826_v12  ;;  %2517 = vmatprep.mubr.bf16.mxu1 %v1713_v5  ;;  %v1586_v47 = vmax.f32 %v1484_v24, 0.0  ;;  %v3867_v28 = vld [vmem:[#allocation9 + $0x8] sm:$0xff]  }
 0x2ef   :  { %v1487_v18 = vpop.f32.mrf.mxu0  ;;  %3742 = vmatprep.subr.bf16.mxu0 %v5172_v59  ;;  %v1416_v34 = vpop.f32.mrf.mxu1  ;;  %2518 = vmatmul.mubr.bf16.gmra.mxu1 %v1712_v21  ;;  %v1649_v48 = vmax.f32 %v1413_v25, 0.0  ;;  %v1648_v12 = vmax.f32 %v1411_v31, 0.0 }
 0x2f0   :  { %v1488_v22 = vadd.f32 %v1487_v18, %v4867_v4  ;;  %2582 = vmatprep.mubr.bf16.mxu0 %v1683_v13  ;;  %v1417_v38 = vadd.f32 %v1416_v34, %v4823_v11  ;;  %v1587_v41 = vmax.f32 %v1486_v43, 0.0  ;;  %v1656_v44 = vmax.f32 %v1415_v27, 0.0 }
 0x2f1   :  { %v1489_v29 = vpop.f32.mrf.mxu0  ;;  %2583 = vmatmul.mubr.bf16.gmra.mxu0 %v1682_v16 }
 0x2f2   :  { %v1490_v33 = vadd.f32 %v1489_v29, %v4864_v63  ;;  %3743 = vmatpush3.bf16.msra.mxu0 %v3865_v55  ;;  %v1594_v37 = vmax.f32 %v1488_v22, 0.0  ;;  %v1657_v49 = vmax.f32 %v1417_v38, 0.0  ;;  %v1720_v11 = vpack.c.bf16 %v1656_v44, %v1648_v12 }
 0x2f3   :  { %v1493_v39 = vpop.f32.mrf.mxu0  ;;  %3744 = vmatprep.subr.bf16.mxu0 %v5172_v59 }
 0x2f4   :  { %v1595_v46 = vmax.f32 %v1490_v33, 0.0  ;;  %v1690_v56 = vpack.c.bf16 %v1594_v37, %v1586_v47  ;;  %v1721_v58 = vpack.c.bf16 %v1657_v49, %v1649_v48  ;;  %v1494_v20 = vadd.f32 %v1493_v39, %v4867_v4 }
 0x2f5   :  { %v1495_v52 = vpop.f32.mrf.mxu0 }
 0x2f6   :  { %v1691_v53 = vpack.c.bf16 %v1595_v46, %v1587_v41  ;;  %3745 = vmatpush3.bf16.msra.mxu0 %v3866_v35  ;;  %v1496_v1 = vadd.f32 %v1495_v52, %v4864_v63  ;;  %2525 = vmatprep.mubr.bf16.mxu1 %v1721_v58  ;;  %v1602_v0 = vmax.f32 %v1494_v20, 0.0 }
 0x2f7   :  { %v1497_v61 = vpop.f32.mrf.mxu0  ;;  %3746 = vmatprep.subr.bf16.mxu0 %v5172_v59  ;;  %2526 = vmatmul.mubr.bf16.gmra.mxu1 %v1720_v11 }
 0x2f8   :  { %v1498_v3 = vadd.f32 %v1497_v61, %v4867_v4  ;;  %2590 = vmatprep.mubr.bf16.mxu0 %v1691_v53  ;;  %3731 = vmatprep.mubr.msk.f32.mxu1 %vm4061_vm5, %v5172_v59  ;;  %v1603_v62 = vmax.f32 %v1496_v1, 0.0 }
 0x2f9   :  { %v1499_v54 = vpop.f32.mrf.mxu0  ;;  %2591 = vmatmul.mubr.bf16.gmra.mxu0 %v1690_v56 }
 0x2fa   :  { %v1500_v42 = vadd.f32 %v1499_v54, %v4864_v63  ;;  %3747 = vmatpush3.bf16.msra.mxu0 %v3867_v28  ;;  %v1610_v7 = vmax.f32 %v1498_v3, 0.0 }
 0x2fb   :  { %v1503_v9 = vpop.f32.mrf.mxu0  ;;  %3748 = vmatprep.subr.bf16.mxu0 %v5172_v59 }
 0x2fc   :  { %v1611_v13 = vmax.f32 %v1500_v42, 0.0  ;;  %v1698_v5 = vpack.c.bf16 %v1610_v7, %v1602_v0  ;;  %v1504_v22 = vadd.f32 %v1503_v9, %v4867_v4  ;;  %v2847_v0 = vpack.c.bf16 %v4758_v8, %v4758_v8 }
 0x2fd   :  { %v1505_v55 = vpop.f32.mrf.mxu0 }
 0x2fe   :  { %v1699_v16 = vpack.c.bf16 %v1611_v13, %v1603_v62  ;;  %3749 = vmatpush3.bf16.msra.mxu0 %v3868_v14  ;;  %v1506_v21 = vadd.f32 %v1505_v55, %v4864_v63  ;;  %v1618_v33 = vmax.f32 %v1504_v22, 0.0 }
 0x2ff   :  { %v1507_v18 = vpop.f32.mrf.mxu0  ;;  %3774 = vmatprep.subr.mxu0 %v5172_v59 }
 0x300   :  { %v1508_v43 = vadd.f32 %v1507_v18, %v4867_v4  ;;  %2598 = vmatprep.mubr.bf16.mxu0 %v1699_v16  ;;  %v1619_v29 = vmax.f32 %v1506_v21, 0.0 }
 0x301   :  { %v1509_v23 = vpop.f32.mrf.mxu0  ;;  %2599 = vmatmul.mubr.bf16.gmra.mxu0 %v1698_v5 }
 0x302   :  { %v1510_v24 = vadd.f32 %v1509_v23, %v4864_v63  ;;  %v1626_v25 = vmax.f32 %v1508_v43, 0.0 }
 0x303   :  { %v1513_v27 = vpop.f32.mrf.mxu0 }
 0x304   :  { %v1627_v31 = vmax.f32 %v1510_v24, 0.0  ;;  %v1706_v37 = vpack.c.bf16 %v1626_v25, %v1618_v33  ;;  %v1514_v44 = vadd.f32 %v1513_v27, %v4867_v4 }
 0x305   :  { %v1515_v34 = vpop.f32.mrf.mxu0 }
 0x306   :  { %v1707_v35 = vpack.c.bf16 %v1627_v31, %v1619_v29  ;;  %v1516_v39 = vadd.f32 %v1515_v34, %v4864_v63  ;;  %v1634_v53 = vmax.f32 %v1514_v44, 0.0  ;;  %v4933_v44 = vld [vmem:[#allocation6] ss:$0 sm:$0xff] }
 0x307   :  { %v1517_v38 = vpop.f32.mrf.mxu0 }
 0x308   :  { %v1518_v41 = vadd.f32 %v1517_v38, %v4867_v4  ;;  %2606 = vmatprep.mubr.bf16.mxu0 %v1707_v35  ;;  %v1635_v52 = vmax.f32 %v1516_v39, 0.0 }
 0x309   :  { %v1519_v46 = vpop.f32.mrf.mxu0  ;;  %2607 = vmatmul.mubr.bf16.gmra.mxu0 %v1706_v37 }
 0x30a   :  { %v1520_v47 = vadd.f32 %v1519_v46, %v4864_v63  ;;  %v1642_v48 = vmax.f32 %v1518_v41, 0.0 }
 0x30b   :  { %v1523_v49 = vpop.f32.mrf.mxu0 }
 0x30c   :  { %v1643_v12 = vmax.f32 %v1520_v47, 0.0  ;;  %v1714_v58 = vpack.c.bf16 %v1642_v48, %v1634_v53  ;;  %v1524_v3 = vadd.f32 %v1523_v49, %v4867_v4 }
 0x30d   :  { %v1525_v28 = vpop.f32.mrf.mxu0 }
 0x30e   :  { %v1715_v56 = vpack.c.bf16 %v1643_v12, %v1635_v52  ;;  %v1526_v11 = vadd.f32 %v1525_v28, %v4864_v63  ;;  %v1650_v9 = vmax.f32 %v1524_v3, 0.0 }
 0x30f   :  { %v1527_v61 = vpop.f32.mrf.mxu0 }
 0x310   :  { %v1528_v1 = vadd.f32 %v1527_v61, %v4867_v4  ;;  %2614 = vmatprep.mubr.bf16.mxu0 %v1715_v56  ;;  %v1651_v14 = vmax.f32 %v1526_v11, 0.0 }
 0x311   :  { %v1529_v20 = vpop.f32.mrf.mxu0  ;;  %2615 = vmatmul.mubr.bf16.gmra.mxu0 %v1714_v58 }
 0x312   :  { %v1530_v54 = vadd.f32 %v1529_v20, %v4864_v63  ;;  %v1658_v42 = vmax.f32 %v1528_v1, 0.0 }
 0x314   :  { %v1659_v7 = vmax.f32 %v1530_v54, 0.0  ;;  %v1722_v13 = vpack.c.bf16 %v1658_v42, %v1650_v9 }
 0x316   :  { %v1723_v62 = vpack.c.bf16 %v1659_v7, %v1651_v14 }
 0x318   :  { %2622 = vmatprep.mubr.bf16.mxu0 %v1723_v62 }
 0x319   :  { %2623 = vmatmul.mubr.bf16.gmra.mxu0 %v1722_v13 }
 0x31a   :  { %3750 = vmatprep.mubr.msk.bf16.mxu0 %vm4061_vm5, %v5172_v59 }
 0x321   :  { %3751 = vmatmul.mubr.bf16.vlgmr.msra.gmra.mxu0 %v2847_v0 }
 0x322   :  { %3776 = vmatprep.mubr.msk.f32.mxu0 %vm4061_vm5, %v5172_v59 }
 0x33d   :  { %v3364_v4 = vpop.f32.mrf.mxu1 }
 0x33f   :  { %v3365_v63 = vpop.f32.mrf.mxu1 }
 0x340   :  { %v3366_v55 = vadd.f32 %v3365_v63, %v3364_v4 }
 0x341   :  { %v3367_v16 = vpop.f32.mrf.mxu1 }
 0x342   :  { %v2278_v52 = vadd.f32 %v3366_v55, %v4933_v44 }
 0x343   :  { %v3368_v5 = vpop.f32.mrf.mxu1 }
 0x344   :  { %v3369_v18 = vadd.f32 %v3368_v5, %v3367_v16 }
 0x346   :  { %v2281_v1 = vadd.f32 %v3369_v18, %v4933_v44 }
 0x347   :  { %v3370_v21 = vpop.f32.mrf.mxu1 }
 0x349   :  { %v3371_v43 = vpop.f32.mrf.mxu1 }
 0x34a   :  { %v3372_v22 = vadd.f32 %v3371_v43, %v3370_v21 }
 0x34b   :  { %v3373_v23 = vpop.f32.mrf.mxu1 }
 0x34c   :  { %v2286_v62 = vadd.f32 %v3372_v22, %v4933_v44 }
 0x34d   :  { %v3374_v24 = vpop.f32.mrf.mxu1 }
 0x34e   :  { %v3375_v25 = vadd.f32 %v3374_v24, %v3373_v23 }
 0x34f   :  { %v3376_v27 = vpop.f32.mrf.mxu1 }
 0x350   :  { %v2289_v18 = vadd.f32 %v3375_v25, %v4933_v44 }
 0x351   :  { %v3377_v29 = vpop.f32.mrf.mxu1 }
 0x352   :  { %v3378_v31 = vadd.f32 %v3377_v29, %v3376_v27 }
 0x353   :  { %v3379_v8 = vpop.f32.mrf.mxu1 }
 0x354   :  { %v2294_v22 = vadd.f32 %v3378_v31, %v4933_v44 }
 0x355   :  { %v3380_v33 = vpop.f32.mrf.mxu1 }
 0x356   :  { %v3381_v34 = vadd.f32 %v3380_v33, %v3379_v8 }
 0x357   :  { %v3382_v35 = vpop.f32.mrf.mxu1 }
 0x359   :  { %v3383_v37 = vpop.f32.mrf.mxu1 }
 0x35a   :  { %v3384_v38 = vadd.f32 %v3383_v37, %v3382_v35 }
 0x35b   :  { %v3385_v39 = vpop.f32.mrf.mxu1 }
 0x35d   :  { %v3386_v41 = vpop.f32.mrf.mxu1 }
 0x35e   :  { %v3387_v46 = vadd.f32 %v3386_v41, %v3385_v39 }
 0x35f   :  { %v3388_v48 = vpop.f32.mrf.mxu1 }
 0x361   :  { %v3428_v47 = vpop.f32.mrf.mxu0  ;;  %v3389_v53 = vpop.f32.mrf.mxu1 }
 0x362   :  { %v3390_v28 = vadd.f32 %v3389_v53, %v3388_v48  ;;  %v2297_v48 = vadd.f32 %v3381_v34, %v4933_v44 }
 0x363   :  { %v3429_v49 = vpop.f32.mrf.mxu0  ;;  %v3391_v61 = vpop.f32.mrf.mxu1 }
 0x364   :  { %v3430_v12 = vadd.f32 %v3429_v49, %v3428_v47 }
 0x365   :  { %v3431_v56 = vpop.f32.mrf.mxu0  ;;  %v3392_v20 = vpop.f32.mrf.mxu1 }
 0x366   :  { %v4936_v58 = vadd.f32 %v3430_v12, %v2278_v52  ;;  %v3393_v54 = vadd.f32 %v3392_v20, %v3391_v61 }
 0x367   :  { %v3432_v11 = vpop.f32.mrf.mxu0  ;;  %v3394_v7 = vpop.f32.mrf.mxu1 }
 0x368   :  { %v3433_v3 = vadd.f32 %v3432_v11, %v3431_v56  ;;  %v2302_v11 = vadd.f32 %v3384_v38, %v4933_v44 }
 0x369   :  { %v3434_v42 = vpop.f32.mrf.mxu0  ;;  %v3395_v0 = vpop.f32.mrf.mxu1 }
 0x36a   :  { %v4939_v14 = vadd.f32 %v3433_v3, %v2281_v1  ;;  %v3396_v4 = vadd.f32 %v3395_v0, %v3394_v7 }
 0x36b   :  { %v3435_v9 = vpop.f32.mrf.mxu0  ;;  %v3397_v16 = vpop.f32.mrf.mxu1 }
 0x36c   :  { %v3436_v13 = vadd.f32 %v3435_v9, %v3434_v42 }
 0x36d   :  { %v3437_v63 = vpop.f32.mrf.mxu0  ;;  %v3398_v43 = vpop.f32.mrf.mxu1 }
 0x36e   :  { %v4942_v55 = vadd.f32 %v3436_v13, %v2286_v62  ;;  %v4945_v23 = vadd.f32 %v3398_v43, %v3397_v16  ;;  %v2305_v62 = vadd.f32 %v3387_v46, %v4933_v44 }
 0x36f   :  { %v3438_v5 = vpop.f32.mrf.mxu0  ;;  %v3400_v29 = vpop.f32.mrf.mxu1 }
 0x370   :  { %v3439_v21 = vadd.f32 %v3438_v5, %v3437_v63 }
 0x371   :  { %v3440_v24 = vpop.f32.mrf.mxu0  ;;  %v3401_v35 = vpop.f32.mrf.mxu1 }
 0x372   :  { %v4947_v27 = vadd.f32 %v3439_v21, %v2289_v18  ;;  %v4950_v37 = vadd.f32 %v3401_v35, %v3400_v29  ;;  %v2310_v18 = vadd.f32 %v3390_v28, %v4933_v44  ;;  %v2313_v35 = vadd.f32 %v3393_v54, %v4933_v44 }
 0x373   :  { %v3441_v8 = vpop.f32.mrf.mxu0  ;;  %v3403_v47 = vpop.f32.mrf.mxu1 }
 0x374   :  { %v3442_v33 = vadd.f32 %v3441_v8, %v3440_v24 }
 0x375   :  { %v3443_v39 = vpop.f32.mrf.mxu0  ;;  %v3404_v52 = vpop.f32.mrf.mxu1 }
 0x376   :  { %v4952_v41 = vadd.f32 %v3442_v33, %v2294_v22  ;;  %v4955_v12 = vadd.f32 %v3404_v52, %v3403_v47 }
 0x377   :  { %v3444_v25 = vpop.f32.mrf.mxu0  ;;  %v3406_v61 = vpop.f32.mrf.mxu1 }
 0x378   :  { %v3445_v49 = vadd.f32 %v3444_v25, %v3443_v39 }
 0x379   :  { %v3446_v53 = vpop.f32.mrf.mxu0  ;;  %v3407_v3 = vpop.f32.mrf.mxu1 }
 0x37a   :  { %v4957_v56 = vadd.f32 %v3445_v49, %v2297_v48  ;;  %v4960_v20 = vadd.f32 %v3407_v3, %v3406_v61  ;;  %v2318_v61 = vadd.f32 %v3396_v4, %v4933_v44 }
 0x37b   :  { %v3447_v31 = vpop.f32.mrf.mxu0  ;;  %v4964_v9 = vpop.f32.mrf.mxu1 }
 0x37c   :  { %5202 = vst [vmem:[#allocation33_spill] sm:$0xff] %v4957_v56  ;;  %v3448_v1 = vadd.f32 %v3447_v31, %v3446_v53 }
 0x37d   :  { %v3449_v42 = vpop.f32.mrf.mxu0  ;;  %v4967_v0 = vpop.f32.mrf.mxu1 }
 0x37e   :  { %v4962_v7 = vadd.f32 %v3448_v1, %v2302_v11  ;;  %v3411_v56 = vadd.f32 %v4967_v0, %v4964_v9 }
 0x37f   :  { %v3450_v34 = vpop.f32.mrf.mxu0  ;;  %v3492_v5 = vpop.f32.mrf.mxu1 }
 0x380   :  { %5203 = vst [vmem:[#allocation34_spill] sm:$0xff] %v4962_v7  ;;  %v3451_v13 = vadd.f32 %v3450_v34, %v3449_v42 }
 0x381   :  { %v3452_v63 = vpop.f32.mrf.mxu0  ;;  %v3493_v43 = vpop.f32.mrf.mxu1 }
 0x382   :  { %v4969_v16 = vadd.f32 %v3451_v13, %v2305_v62  ;;  %v3494_v24 = vadd.f32 %v3493_v43, %v3492_v5  ;;  %v2321_v62 = vadd.f32 %v4945_v23, %v4933_v44  ;;  %v2326_v43 = vadd.f32 %v4950_v37, %v4933_v44 }
 0x383   :  { %v3453_v38 = vpop.f32.mrf.mxu0  ;;  %v3495_v22 = vpop.f32.mrf.mxu1 }
 0x384   :  { %5204 = vst [vmem:[#allocation35_spill] sm:$0xff] %v4969_v16  ;;  %v3454_v21 = vadd.f32 %v3453_v38, %v3452_v63  ;;  %v2472_v33 = vadd.f32 %v3494_v24, %v4936_v58 }
 0x385   :  { %v3455_v29 = vpop.f32.mrf.mxu0  ;;  %v3496_v47 = vpop.f32.mrf.mxu1 }
 0x386   :  { %v4972_v8 = vadd.f32 %v3454_v21, %v2310_v18  ;;  %v3497_v25 = vadd.f32 %v3496_v47, %v3495_v22  ;;  %v2329_v47 = vadd.f32 %v4955_v12, %v4933_v44 }
 0x387   :  { %v3456_v46 = vpop.f32.mrf.mxu0  ;;  %v3498_v52 = vpop.f32.mrf.mxu1 }
 0x388   :  { %5205 = vst [vmem:[#allocation36_spill] sm:$0xff] %v4972_v8  ;;  %v3457_v39 = vadd.f32 %v3456_v46, %v3455_v29  ;;  %v2475_v28 = vadd.f32 %v3497_v25, %v4939_v14 }
 0x389   :  { %v3458_v48 = vpop.f32.mrf.mxu0  ;;  %v3499_v11 = vpop.f32.mrf.mxu1 }
 0x38a   :  { %v4976_v49 = vadd.f32 %v3457_v39, %v2313_v35  ;;  %v3500_v1 = vadd.f32 %v3499_v11, %v3498_v52 }
 0x38b   :  { %v3459_v53 = vpop.f32.mrf.mxu0  ;;  %v3501_v42 = vpop.f32.mrf.mxu1 }
 0x38c   :  { %v3460_v31 = vadd.f32 %v3459_v53, %v3458_v48  ;;  %v2480_v54 = vadd.f32 %v3500_v1, %v4942_v55 }
 0x38d   :  { %v3461_v3 = vpop.f32.mrf.mxu0  ;;  %v3502_v63 = vpop.f32.mrf.mxu1 }
 0x38e   :  { %v4980_v58 = vadd.f32 %v3460_v31, %v2318_v61  ;;  %v3503_v5 = vadd.f32 %v3502_v63, %v3501_v42  ;;  %v2334_v61 = vadd.f32 %v4960_v20, %v4933_v44 }
 0x38f   :  { %v3462_v34 = vpop.f32.mrf.mxu0  ;;  %v3504_v4 = vpop.f32.mrf.mxu1 }
 0x390   :  { %v3463_v13 = vadd.f32 %v3462_v34, %v3461_v3  ;;  %v2483_v18 = vadd.f32 %v3503_v5, %v4947_v27 }
 0x391   :  { %v3464_v14 = vpop.f32.mrf.mxu0  ;;  %v3505_v29 = vpop.f32.mrf.mxu1 }
 0x392   :  { %v4985_v38 = vadd.f32 %v3463_v13, %v2321_v62  ;;  %v3506_v55 = vadd.f32 %v3505_v29, %v3504_v4 }
 0x393   :  { %v3465_v21 = vpop.f32.mrf.mxu0  ;;  %v4992_v23 = vpop.f32.mrf.mxu1 }
 0x394   :  { %v3466_v24 = vadd.f32 %v3465_v21, %v3464_v14  ;;  %5206 = vst [vmem:[#allocation37_spill] sm:$0xff] %v4992_v23  ;;  %v2488_v35 = vadd.f32 %v3506_v55, %v4952_v41  ;;  %v5061_v23 = vpop.permute.xlu0 %2713 }
 0x395   :  { %v3467_v22 = vpop.f32.mrf.mxu0  ;;  %v4997_v27 = vpop.f32.mrf.mxu1  ;;  %vm2738_vm10 = vcmp.eq.s32.totalorder %v5061_v23, 1 }
 0x396   :  { %v4990_v46 = vadd.f32 %v3466_v24, %v2326_v43  ;;  %5207 = vst [vmem:[#allocation38_spill] sm:$0xff] %v4997_v27 }
 0x397   :  { %v3468_v39 = vpop.f32.mrf.mxu0  ;;  %v5001_v37 = vpop.f32.mrf.mxu1 }
 0x398   :  { %v3469_v25 = vadd.f32 %v3468_v39, %v3467_v22  ;;  %5208 = vst [vmem:[#allocation39_spill] sm:$0xff] %v5001_v37 }
 0x399   :  { %v3470_v48 = vpop.f32.mrf.mxu0  ;;  %v5005_v11 = vpop.f32.mrf.mxu1 }
 0x39a   :  { %v4999_v52 = vadd.f32 %v3469_v25, %v2329_v47  ;;  %5209 = vst [vmem:[#allocation40_spill] sm:$0xff] %v5005_v11 }
 0x39b   :  { %v3471_v53 = vpop.f32.mrf.mxu0  ;;  %v5011_v12 = vpop.f32.mrf.mxu1 }
 0x39c   :  { %v3472_v31 = vadd.f32 %v3471_v53, %v3470_v48 }
 0x39d   :  { %v5007_v41 = vpop.f32.mrf.mxu0  ;;  %v5013_v42 = vpop.f32.mrf.mxu1 }
 0x39e   :  { %v5009_v1 = vadd.f32 %v3472_v31, %v2334_v61 }
 0x39f   :  { %v3474_v3 = vpop.f32.mrf.mxu0  ;;  %v5015_v62 = vpop.f32.mrf.mxu1 }
 0x3a0   :  { %v3475_v7 = vadd.f32 %v3474_v3, %v5007_v41 }
 0x3a1   :  { %v3556_v34 = vpop.f32.mrf.mxu0  ;;  %v5017_v5 = vpop.f32.mrf.mxu1 }
 0x3a3   :  { %v3557_v13 = vpop.f32.mrf.mxu0  ;;  %v5021_v4 = vpop.f32.mrf.mxu1 }
 0x3a4   :  { %v3558_v63 = vadd.f32 %v3557_v13, %v3556_v34 }
 0x3a5   :  { %v3559_v20 = vpop.f32.mrf.mxu0  ;;  %v5023_v24 = vpop.f32.mrf.mxu1 }
 0x3a6   :  { %v5019_v14 = vadd.f32 %v3558_v63, %v2472_v33 }
 0x3a7   :  { %v3560_v21 = vpop.f32.mrf.mxu0  ;;  %v5027_v47 = vpop.f32.mrf.mxu1 }
 0x3a8   :  { %5210 = vst [vmem:[#allocation41_spill] sm:$0xff] %v5019_v14  ;;  %v3561_v43 = vadd.f32 %v3560_v21, %v3559_v20 }
 0x3a9   :  { %v3562_v29 = vpop.f32.mrf.mxu0  ;;  %v5031_v33 = vpop.f32.mrf.mxu1 }
 0x3aa   :  { %v5025_v55 = vadd.f32 %v3561_v43, %v2475_v28 }
 0x3ab   :  { %v3563_v22 = vpop.f32.mrf.mxu0  ;;  %v3525_v20 = vpop.f32.mrf.mxu1 }
 0x3ac   :  { %5211 = vst [vmem:[#allocation42_spill] sm:$0xff] %v5025_v55  ;;  %v3564_v39 = vadd.f32 %v3563_v22, %v3562_v29 }
 0x3ad   :  { %v3565_v25 = vpop.f32.mrf.mxu0  ;;  %v3526_v29 = vpop.f32.mrf.mxu1 }
 0x3ae   :  { %v5029_v48 = vadd.f32 %v3564_v39, %v2480_v54  ;;  %v3527_v3 = vadd.f32 %v3526_v29, %v3525_v20  ;;  %v5232_v29 = vld [vmem:[#allocation38_spill] sm:$0xff] }
 0x3af   :  { %v3566_v53 = vpop.f32.mrf.mxu0  ;;  %v3528_v39 = vpop.f32.mrf.mxu1 }
 0x3b0   :  { %5212 = vst [vmem:[#allocation43_spill] sm:$0xff] %v5029_v48  ;;  %v3567_v61 = vadd.f32 %v3566_v53, %v3565_v25  ;;  %v2515_v32 = vadd.f32 %v3527_v3, %v4985_v38 }
 0x3b1   :  { %v3568_v31 = vpop.f32.mrf.mxu0 }
 0x3b2   :  { %v5033_v34 = vadd.f32 %v3567_v61, %v2483_v18  ;;  %v3529_v18 = vpop.f32.mrf.mxu1 }
 0x3b3   :  { %v3569_v13 = vpop.f32.mrf.mxu0  ;;  %v3530_v8 = vadd.f32 %v3529_v18, %v3528_v39 }
 0x3b4   :  { %5213 = vst [vmem:[#allocation44_spill] sm:$0xff] %v5033_v34  ;;  %v3570_v63 = vadd.f32 %v3569_v13, %v3568_v31  ;;  %v3531_v13 = vpop.f32.mrf.mxu1 }
 0x3b5   :  { %v5035_v21 = vpop.f32.mrf.mxu0 }
 0x3b6   :  { %5214 = vst [vmem:[#allocation45_spill] sm:$0xff] %v5035_v21  ;;  %v5037_v28 = vadd.f32 %v3570_v63, %v2488_v35  ;;  %v3532_v59 = vpop.f32.mrf.mxu1  ;;  %v2717_v21 = vpop.permute.xlu1 %2716 }
 0x3b7   :  { %v5039_v43 = vpop.f32.mrf.mxu0  ;;  %vm2739_vm9 = vcmp.eq.s32.totalorder %v2717_v21, 1  ;;  %v5230_v21 = vld [vmem:[#allocation30_spill] sm:$0xff] }
 0x3b8   :  { %5215 = vst [vmem:[#allocation46_spill] sm:$0xff] %v5037_v28  ;;  %5216 = vst [vmem:[#allocation47_spill] sm:$0xff] %v5039_v43  ;;  %v3534_v55 = vpop.f32.mrf.mxu1 }
 0x3b9   :  { %v5041_v22 = vpop.f32.mrf.mxu0 }
 0x3ba   :  { %5217 = vst [vmem:[#allocation48_spill] sm:$0xff] %v5041_v22  ;;  %v3535_v40 = vpop.f32.mrf.mxu1  ;;  %v5063_v37 = vpop.permute.xlu1 %2710 }
 0x3bb   :  { %v5043_v54 = vpop.f32.mrf.mxu0  ;;  %v3536_v22 = vadd.f32 %v3535_v40, %v3534_v55  ;;  %v5222_v55 = vmov 0.0   ;;  %vm2737_vm11 = vcmp.eq.s32.totalorder %v5063_v37, 1 }
 0x3bc   :  { %5218 = vst [vmem:[#allocation49_spill] sm:$0xff] %v5043_v54  ;;  %v3537_v50 = vpop.f32.mrf.mxu1  ;;  %v2337_v54 = vadd.f32 %v3411_v56, %v4933_v44  ;;  %v2708_v56 = vpop.permute.xlu0 %2707 }
 0x3bd   :  { %v5045_v25 = vpop.f32.mrf.mxu0  ;;  %v2528_v9 = vadd.f32 %v3536_v22, %v5009_v1  ;;  %v5233_v22 = vld [vmem:[#allocation35_spill] sm:$0xff]  ;;  %vm2736_vm12 = vcmp.eq.s32.totalorder %v2708_v56, 1  ;;  %v5238_v37 = vld [vmem:[#allocation45_spill] sm:$0xff] }
 0x3be   :  { %5219 = vst [vmem:[#allocation50_spill] sm:$0xff] %v5045_v25  ;;  %v3538_v30 = vpop.f32.mrf.mxu1  ;;  %v2434_v45 = vadd.f32 %v3475_v7, %v2337_v54  ;;  %v2520_v7 = vadd.f32 %v3530_v8, %v4990_v46  ;;  %v5242_v56 = vld [vmem:[#allocation29_spill] sm:$0xff] }
 0x3bf   :  { %v5047_v53 = vpop.f32.mrf.mxu0  ;;  %v3539_v16 = vadd.f32 %v3538_v30, %v3537_v50 }
 0x3c0   :  { %5220 = vst [vmem:[#allocation51_spill] sm:$0xff] %v5047_v53  ;;  %v3533_v53 = vadd.f32 %v3532_v59, %v3531_v13  ;;  %v3524_v59 = vadd.f32 %v5031_v33, %v5027_v47  ;;  %v2702_v36 = vpop.permute.xlu0 %2701 }
 0x3c1   :  { %v5049_v61 = vpop.f32.mrf.mxu0  ;;  %v2531_v0 = vadd.f32 %v3539_v16, %v2434_v45  ;;  %v5234_v39 = vld [vmem:[#allocation48_spill] sm:$0xff]  ;;  %vm2734_vm14 = vcmp.eq.s32.totalorder %v2702_v36, 1  ;;  %v5250_v36 = vld [vmem:[#allocation23_spill] sm:$0xff] }
 0x3c2   :  { %v2523_v40 = vadd.f32 %v3533_v53, %v4999_v52 }
 0x3c3   :  { %v5051_v31 = vpop.f32.mrf.mxu0 }
 0x3c4   :  { %5221 = vst [vmem:[#allocation52_spill] sm:$0xff] %v5051_v31 }
 0x3c5   :  { %v5053_v35 = vpop.f32.mrf.mxu0  ;;  %v5228_v33 = vld [vmem:[#allocation50_spill] sm:$0xff] }
 0x3c7   :  { %v5055_v63 = vpop.f32.mrf.mxu0 }
 0x3c9   :  { %v3586_v14 = vpop.f32.mrf.mxu0 }
 0x3cb   :  { %v3587_v26 = vpop.f32.mrf.mxu0  ;;  %v5223_v46 = vld [vmem:[#allocation52_spill] sm:$0xff] }
 0x3cc   :  { %v3588_v52 = vadd.f32 %v3587_v26, %v3586_v14 }
 0x3cd   :  { %v3589_v19 = vpop.f32.mrf.mxu0 }
 0x3cf   :  { %v3590_v48 = vpop.f32.mrf.mxu0 }
 0x3d0   :  { %v3591_v1 = vadd.f32 %v3590_v48, %v3589_v19  ;;  %v3518_v19 = vadd.f32 %v5017_v5, %v5015_v62  ;;  %v3582_v62 = vadd.f32 %v5223_v46, %v5049_v61  ;;  %v5224_v5 = vld [vmem:[#allocation32_spill] sm:$0xff]  ;;  %v5236_v61 = vld [vmem:[#allocation31_spill] sm:$0xff] }
 0x3d1   :  { %v3592_v34 = vpop.f32.mrf.mxu0 }
 0x3d2   :  { %v2612_v8 = vadd.f32 %v3591_v1, %v2515_v32 }
 0x3d3   :  { %v3593_v28 = vpop.f32.mrf.mxu0 }
 0x3d4   :  { %v3594_v50 = vadd.f32 %v3593_v28, %v3592_v34  ;;  %v5229_v34 = vld [vmem:[#allocation51_spill] sm:$0xff]  ;;  %v2754_v28 = vsel %vm2738_vm10, %v2612_v8, %v5230_v21  ;;  %v5249_v8 = vld [vmem:[#allocation44_spill] sm:$0xff] }
 0x3d5   :  { %v3595_v17 = vpop.f32.mrf.mxu0  ;;  %v3876_v21 = vld [vmem:[#allocation7] sm:$0xff]  }
 0x3d7   :  { %v3596_v6 = vpop.f32.mrf.mxu0 }
 0x3d8   :  { %v3597_v2 = vadd.f32 %v3596_v6, %v3595_v17  ;;  %v3521_v17 = vadd.f32 %v5023_v24, %v5021_v4  ;;  %v5225_v4 = vld [vmem:[#allocation39_spill] sm:$0xff] }
 0x3d9   :  { %v3598_v43 = vpop.f32.mrf.mxu0 }
 0x3da   :  { %v2620_v45 = vadd.f32 %v3597_v2, %v2523_v40  ;;  %v2512_v2 = vadd.f32 %v3524_v59, %v4980_v58  ;;  %v2507_v38 = vadd.f32 %v3521_v17, %v4976_v49  ;;  %v3579_v49 = vadd.f32 %v5229_v34, %v5228_v33  ;;  %v5240_v40 = vld [vmem:[#allocation28_spill] sm:$0xff]  ;;  %v3872_v33 = vld [vmem:[#allocation7 + $0x20] sm:$0xff]   ;;  %v3873_v34 = vld [vmem:[#allocation7 + $0x18] sm:$0xff]  }
 0x3db   :  { %v3599_v51 = vpop.f32.mrf.mxu0 }
 0x3dc   :  { %v3600_v25 = vadd.f32 %v3599_v51, %v3598_v43  ;;  %v2756_v26 = vsel %vm2740_vm8, %v2620_v45, %v4655_v57  ;;  %v2609_v58 = vadd.f32 %v3588_v52, %v2512_v2  ;;  %v5226_v57 = vld [vmem:[#allocation40_spill] sm:$0xff]  ;;  %v5231_v43 = vld [vmem:[#allocation37_spill] sm:$0xff]  ;;  %v5243_v45 = vld [vmem:[#allocation26_spill] sm:$0xff] }
 0x3dd   :  { %v3601_v27 = vpop.f32.mrf.mxu0  ;;  %v3512_v24 = vadd.f32 %v5226_v57, %v5225_v4  ;;  %v3509_v23 = vadd.f32 %v5232_v29, %v5231_v43  ;;  %v5245_v52 = vld [vmem:[#allocation24_spill] sm:$0xff]  ;;  %v3869_v4 = vld [vmem:[#allocation7 + $0x38] sm:$0xff]  }
 0x3de   :  { %v2625_v30 = vadd.f32 %v3600_v25, %v2528_v9  ;;  %v5235_v25 = vld [vmem:[#allocation49_spill] sm:$0xff]  ;;  %v2753_v13 = vsel %vm2737_vm11, %v2609_v58, %v5236_v61  ;;  %v5253_v58 = vld [vmem:[#allocation42_spill] sm:$0xff] }
 0x3df   :  { %v3602_v11 = vpop.f32.mrf.mxu0  ;;  %v3576_v53 = vadd.f32 %v5235_v25, %v5234_v39  ;;  %v5254_v57 = vld [vmem:[#allocation21_spill] sm:$0xff]  ;;  %v3048_v39 = vld [vmem:[#allocation12] sm:$0xff] }
 0x3e0   :  { %v3603_v41 = vadd.f32 %v3602_v11, %v3601_v27  ;;  %v2705_v27 = vpop.permute.xlu1 %2704  ;;  %v2617_v11 = vadd.f32 %v3594_v50, %v2520_v7  ;;  %v2757_v47 = vsel %vm2741_vm7, %v2625_v30, %v4691_v15  ;;  %v3515_v15 = vadd.f32 %v5013_v42, %v5011_v12  ;;  %v5227_v12 = vld [vmem:[#allocation36_spill] sm:$0xff] }
 0x3e1   :  { %v5066_v31 = vpop.f32.mrf.mxu0  ;;  %v2504_v42 = vadd.f32 %v3518_v19, %v5227_v12  ;;  %vm2735_vm13 = vcmp.eq.s32.totalorder %v2705_v27, 1  ;;  %v5247_v19 = vld [vmem:[#allocation46_spill] sm:$0xff]  ;;  %v3870_v12 = vld [vmem:[#allocation7 + $0x30] sm:$0xff]  }
 0x3e2   :  { %v2628_v44 = vadd.f32 %v3603_v41, %v2531_v0  ;;  %v2755_v14 = vsel %vm2739_vm9, %v2617_v11, %v5224_v5  ;;  %v2499_v54 = vadd.f32 %v3515_v15, %v5233_v22  ;;  %v5239_v0 = vld [vmem:[#allocation47_spill] sm:$0xff]  ;;  %v3314_v22 = vld [vmem:[#allocation10] ss:$0 sm:$0xff] }
 0x3e3   :  { %v3752_v51 = vpop.f32.mrf.mxu0  ;;  %v2601_v18 = vadd.f32 %v3582_v62, %v2504_v42  ;;  %v3573_v41 = vadd.f32 %v5239_v0, %v5238_v37  ;;  %v5252_v62 = vld [vmem:[#allocation20_spill] sm:$0xff] }
 0x3e4   :  { %v2758_v6 = vsel %vm2742_vm6, %v2628_v44, %v4679_v10  ;;  %v3585_v10 = vadd.f32 %v5055_v63, %v5053_v35  ;;  %v2699_v48 = vpop.permute.xlu1 %2698  ;;  %v2696_v35 = vpop.permute.xlu0 %2695  ;;  %v5237_v63 = vld [vmem:[#allocation34_spill] sm:$0xff]  ;;  %v2596_v3 = vadd.f32 %v3579_v49, %v2499_v54  ;;  %v5241_v44 = vld [vmem:[#allocation33_spill] sm:$0xff]  ;;  %v3871_v42 = vld [vmem:[#allocation7 + $0x28] sm:$0xff]  }
 0x3e5   :  { %3700 = vmatpush3.msra.mxu1 %v2758_v6  ;;  %v2949_v16 = vpop.f32.mrf.mxu0  ;;  %v2496_v9 = vadd.f32 %v3512_v24, %v5237_v63  ;;  %v2491_v59 = vadd.f32 %v3509_v23, %v5241_v44  ;;  %v2751_v7 = vsel %vm2735_vm13, %v2601_v18, %v5242_v56  ;;  %vm2733_vm15 = vcmp.eq.s32.totalorder %v2699_v48, 1  ;;  %v5255_v24 = vld [vmem:[#allocation41_spill] sm:$0xff] }
 0x3e6   :  { %3701 = vmatprep.subr.mxu1 %v5222_v55  ;;  %v2604_v20 = vadd.f32 %v3585_v10, %v2507_v38  ;;  %v2750_v6 = vsel %vm2734_vm14, %v2596_v3, %v5243_v45  ;;  %v5244_v16 = vld [vmem:[#allocation27_spill] sm:$0xff]  ;;  %vm2732_vm0 = vcmp.eq.s32.totalorder %v2696_v35, 1  ;;  %v5248_v10 = vld [vmem:[#allocation22_spill] sm:$0xff]  ;;  %v3874_v49 = vld [vmem:[#allocation7 + $0x10] sm:$0xff]   ;;  %v4062_v35 = vmov 1.0  }
 0x3e7   :  { %3702 = vmatpush3.msra.mxu1 %v2757_v47  ;;  %v3753_v60 = vpop.f32.mrf.mxu0  ;;  %v2593_v51 = vadd.f32 %v3576_v53, %v2496_v9  ;;  %v2588_v1 = vadd.f32 %v3573_v41, %v2491_v59  ;;  %v5246_v47 = vld [vmem:[#allocation25_spill] sm:$0xff]  ;;  %v5251_v38 = vld [vmem:[#allocation43_spill] sm:$0xff] }
 0x3e8   :  { %3703 = vmatprep.subr.mxu1 %v5222_v55  ;;  %v2752_v50 = vsel %vm2736_vm12, %v2604_v20, %v5240_v40  ;;  %v2693_v30 = vpop.permute.xlu1 %2692  ;;  %v2690_v17 = vpop.permute.xlu0 %2689  ;;  %v3875_v20 = vld [vmem:[#allocation7 + $0x8] sm:$0xff]  }
 0x3e9   :  { %3704 = vmatpush3.msra.mxu1 %v2756_v26  ;;  %v2749_v27 = vsel %vm2733_vm15, %v2593_v51, %v5244_v16  ;;  %v2748_v11 = vsel %vm2732_vm0, %v2588_v1, %v5245_v52  ;;  %vm2731_vm2 = vcmp.eq.s32.totalorder %v2693_v30, 1  ;;  %vm2730_vm3 = vcmp.eq.s32.totalorder %v2690_v17, 1 }
 0x3ea   :  { %3705 = vmatprep.subr.mxu1 %v5222_v55  ;;  %v2747_v60 = vsel %vm2731_vm2, %v5247_v19, %v5246_v47  ;;  %v2746_v26 = vsel %vm2730_vm3, %v5249_v8, %v5248_v10 }
 0x3eb   :  { %3706 = vmatpush3.msra.mxu1 %v2755_v14  ;;  %v2759_v14 = vld [vmem:[%s5158_s4] sm:$0xff] }
 0x3ec   :  { %3707 = vmatprep.subr.mxu1 %v5222_v55  ;;  %v2687_v32 = vpop.permute.xlu1 %2686  ;;  %v2684_v2 = vpop.permute.xlu0 %2683 }
 0x3ed   :  { %3708 = vmatpush3.msra.mxu1 %v2754_v28  ;;  %vm2729_vm4 = vcmp.eq.s32.totalorder %v2687_v32, 1  ;;  %vm2728_vm1 = vcmp.eq.s32.totalorder %v2684_v2, 1 }
 0x3ee   :  { %3709 = vmatprep.subr.mxu1 %v5222_v55  ;;  %v2745_v46 = vsel %vm2729_vm4, %v5251_v38, %v5250_v36  ;;  %v2744_v5 = vsel %vm2728_vm1, %v5253_v58, %v5252_v62 }
 0x3ef   :  { %3710 = vmatpush3.msra.mxu1 %v2753_v13 }
 0x3f0   :  { %3711 = vmatprep.subr.mxu1 %v5222_v55  ;;  %v2681_v15 = vpop.permute.xlu1 %2680 }
 0x3f1   :  { %3712 = vmatpush3.msra.mxu1 %v2752_v50  ;;  %vm2727_vm6 = vcmp.eq.s32.totalorder %v2681_v15, 1 }
 0x3f2   :  { %3713 = vmatprep.subr.mxu1 %v5222_v55  ;;  %v2743_v48 = vsel %vm2727_vm6, %v5255_v24, %v5254_v57 }
 0x3f3   :  { %3714 = vmatpush3.msra.mxu1 %v2751_v7 }
 0x3f4   :  { %3715 = vmatprep.subr.mxu1 %v5222_v55 }
 0x3f5   :  { %3716 = vmatpush3.msra.mxu1 %v2750_v6 }
 0x3f6   :  { %3717 = vmatprep.subr.mxu1 %v5222_v55 }
 0x3f7   :  { %3718 = vmatpush3.msra.mxu1 %v2749_v27 }
 0x3f8   :  { %3719 = vmatprep.subr.mxu1 %v5222_v55 }
 0x3f9   :  { %3720 = vmatpush3.msra.mxu1 %v2748_v11 }
 0x3fa   :  { %3721 = vmatprep.subr.mxu1 %v5222_v55 }
 0x3fb   :  { %3722 = vmatpush3.msra.mxu1 %v2747_v60 }
 0x3fc   :  { %3723 = vmatprep.subr.mxu1 %v5222_v55 }
 0x3fd   :  { %3724 = vmatpush3.msra.mxu1 %v2746_v26 }
 0x3fe   :  { %3725 = vmatprep.subr.mxu1 %v5222_v55 }
 0x3ff   :  { %3726 = vmatpush3.msra.mxu1 %v2745_v46 }
 0x400   :  { %3727 = vmatprep.subr.mxu1 %v5222_v55 }
 0x401   :  { %3728 = vmatpush3.msra.mxu1 %v2744_v5 }
 0x402   :  { %3729 = vmatprep.subr.mxu1 %v5222_v55 }
 0x403   :  { %3730 = vmatpush3.msra.mxu1 %v2743_v48 }
 0x404   :  { %3732 = vmatmul.mubr.f32.vlgmr.msra.gmra.mxu1 %v2759_v14  ;;  %3754 = vmatprep.subr.bf16.mxu1 %v5222_v55 }
 0x405   :  { %3755 = vmatpush3.bf16.msra.mxu1 %v3869_v4  ;;  %3770 = vmatprep.mubr.msk.bf16.mxu1 %vm4061_vm5, %v5222_v55  ;;  %vm3121_vm5 = vcmask 57344  }
 0x406   :  { %3756 = vmatprep.subr.bf16.mxu1 %v5222_v55 }
 0x409   :  { %3757 = vmatpush3.bf16.msra.mxu1 %v3870_v12 }
 0x40a   :  { %3758 = vmatprep.subr.bf16.mxu1 %v5222_v55 }
 0x40d   :  { %3759 = vmatpush3.bf16.msra.mxu1 %v3871_v42 }
 0x40e   :  { %3760 = vmatprep.subr.bf16.mxu1 %v5222_v55 }
 0x411   :  { %3761 = vmatpush3.bf16.msra.mxu1 %v3872_v33 }
 0x412   :  { %3762 = vmatprep.subr.bf16.mxu1 %v5222_v55 }
 0x415   :  { %3763 = vmatpush3.bf16.msra.mxu1 %v3873_v34 }
 0x416   :  { %3764 = vmatprep.subr.bf16.mxu1 %v5222_v55 }
 0x419   :  { %3765 = vmatpush3.bf16.msra.mxu1 %v3874_v49 }
 0x41a   :  { %3766 = vmatprep.subr.bf16.mxu1 %v5222_v55 }
 0x41d   :  { %3767 = vmatpush3.bf16.msra.mxu1 %v3875_v20 }
 0x41e   :  { %3768 = vmatprep.subr.bf16.mxu1 %v5222_v55  ;;  %v3050_v55 = vld [vmem:[#allocation13] sm:$0x1] }
 0x421   :  { %3769 = vmatpush3.bf16.msra.mxu1 %v3876_v21 }
 0x4c4   :  { %v2826_v28 = vpop.f32.mrf.mxu1 }
 0x4c5   :  { %v2830_v43 = vpack.c.bf16 %v2826_v28, %v2826_v28 }
 0x4c6   :  { %v3733_v29 = vpop.f32.mrf.mxu1 }
 0x4c7   :  { %3771 = vmatmul.mubr.bf16.vlgmr.msra.gmra.mxu1 %v2830_v43 }
 0x587   :  { %v3034_v23 = vpop.f32.mrf.mxu1 }
 0x588   :  { %v3035_v54 = vadd.f32 %v3034_v23, %v5066_v31 }
 0x589   :  { %v3772_v25 = vpop.f32.mrf.mxu1 }
 0x58a   :  { %v3047_v53 = vadd.f32 %v3314_v22, %v3035_v54 }
 0x58b   :  { %v3037_v18 = vpop.f32.mrf.mxu1 }
 0x58c   :  { %v3049_v61 = vmul.f32 %v3048_v39, %v3047_v53 }
 0x58d   :  { %v3773_v13 = vpop.f32.mrf.mxu1 }
 0x58e   :  { %3775 = vmatpush3.xpose.msra.mxu0 %v3049_v61 }
 0x591   :  { %3777 = vmatmul.mubr.f32.vlgmr.msra.gmra.mxu0 %v4062_v35 }
 0x651   :  { %v3117_v63 = vpop.f32.mrf.mxu0 }
 0x652   :  { %v3118_v9 = vadd.f32 %v3117_v63, %v3050_v55 }
 0x653   :  { %v3778_v37 = vpop.f32.mrf.mxu0 }
 0x654   :  { %3122 = vst.msk [vmem:[%s5170_s16] sm:$0x1] %vm3121_vm5, %v3118_v9 }
 0x655   :  { %3127 = vsyncpa [#allocation3], 1 }
 0x656   :  { %3128 = vsyncpa [#allocation5], 1 }
 0x657   :  { %3129 = vsyncpa [#allocation8], 1 }
 0x658   :  { %3130 = vsyncpa [#allocation11], 1 }
 0x659   :  { %3131 = vsyncpa [#allocation14], 1 }

</bundles_post_ra>
